<compile_context>
chip_gen: v6e
topology: v6e:2x2x1
jax: 0.10.0
libtpu: 0.0.40
codegen_flags: <defaults>
</compile_context>

<pallas_src>
import functools
import math

import jax
import jax.numpy as jnp
from jax import lax
from jax.experimental import pallas as pl
from jax.experimental.pallas import tpu as pltpu


def _round_up(x, m):
    return ((x + m - 1) // m) * m


# ---------------------------------------------------------------------------
# Kernels: direct 3x3 conv via 9 shifted MXU dots, + BN affine (+ residual)
# ---------------------------------------------------------------------------
def _accum_taps(x_ref, w_ref, acc_ref, *, stride, h_out, w_out):
    """Accumulate the 9 conv taps into acc_ref (f32).

    x_ref: (1, s*s*Hh, Wh, Cin) f32 phase-split, spatially padded image
    w_ref: (9, Cin, tn)          bf16 tap-major weights
    """
    s = stride
    cin = x_ref.shape[-1]
    hh = x_ref.shape[1] // (s * s)
    m = h_out * w_out
    for t in range(9):
        ky, kx = t // 3, t % 3
        base = ((ky % s) * s + (kx % s)) * hh + ky // s   # phase row offset
        dx = kx // s
        xt = x_ref[0, base:base + h_out, dx:dx + w_out, :]      # (h_out, w_out, Cin)
        lhs = xt.reshape(m, cin).astype(jnp.bfloat16)            # (M, Cin)
        contrib = jnp.dot(lhs, w_ref[t], preferred_element_type=jnp.float32)
        if t == 0:
            acc_ref[...] = contrib
        else:
            acc_ref[...] += contrib


def _conv_bn_kernel(x_ref, w_ref, s_ref, b_ref, o_ref, acc_ref,
                    *, stride, h_out, w_out, relu):
    _accum_taps(x_ref, w_ref, acc_ref, stride=stride, h_out=h_out, w_out=w_out)
    out = acc_ref[...] * s_ref[...] + b_ref[...]
    if relu:
        out = jnp.maximum(out, 0.0)
    o_ref[0] = out.astype(o_ref.dtype)


def _conv_bn_res_relu_kernel(x_ref, w_ref, s_ref, b_ref, r_ref, o_ref, acc_ref,
                             *, stride, h_out, w_out):
    # conv + BN + identity residual (bf16 stream) + ReLU
    _accum_taps(x_ref, w_ref, acc_ref, stride=stride, h_out=h_out, w_out=w_out)
    out = acc_ref[...] * s_ref[...] + b_ref[...] + r_ref[0].astype(jnp.float32)
    o_ref[0] = jnp.maximum(out, 0.0).astype(o_ref.dtype)


def _conv_bn_ds_relu_kernel(x_ref, w_ref, s_ref, b_ref,
                            xs_ref, wd_ref, sd_ref, bd_ref, o_ref, acc_ref,
                            *, stride, h_out, w_out):
    # conv + BN + fused (1x1 downsample conv + BN) residual + ReLU
    _accum_taps(x_ref, w_ref, acc_ref, stride=stride, h_out=h_out, w_out=w_out)
    res = jnp.dot(xs_ref[0], wd_ref[...], preferred_element_type=jnp.float32)
    res = res * sd_ref[...] + bd_ref[...]
    out = acc_ref[...] * s_ref[...] + b_ref[...] + res
    o_ref[0] = jnp.maximum(out, 0.0).astype(o_ref.dtype)


# ---------------------------------------------------------------------------
# Fused conv wrapper
# ---------------------------------------------------------------------------
def _fused_conv3x3(xph, w9, scale, bias, *, stride, h_out, w_out, relu=True,
                   residual=None, ds=None, out_dtype=jnp.float32):
    """Direct fused 3x3 conv + BN affine (+ residual / fused downsample) (+ ReLU).

    xph:   (N, s*s*Hh, Wh, Cin) f32  phase-split padded input (_phase_split_pad)
    w9:    (9, Cin, Cout)            tap-major conv weights
    scale/bias: (Cout,)              folded BN affine
    residual:   (N, M, Cout)         identity residual (cast to bf16 here)
    ds:    (xs, wd, sd, bd) with xs (N, M, Cx), wd (Cx, Cout), sd/bd (Cout,)
    Returns (N, M, Cpad), M = h_out*w_out, Cpad = round_up(Cout, 128); the
    padded output channels are exact zeros.
    """
    n = xph.shape[0]
    cin = xph.shape[-1]
    cout = w9.shape[-1]
    m = h_out * w_out
    cpad = _round_up(cout, 128)
    tn = next(t for t in (512, 256, 128) if cpad % t == 0)

    def pad_c(a):
        if a.shape[-1] == cpad:
            return a
        pads = [(0, 0)] * (a.ndim - 1) + [(0, cpad - a.shape[-1])]
        return jnp.pad(a, pads)

    xph = xph.astype(jnp.float32)
    w_p = pad_c(w9).astype(jnp.bfloat16)
    s_p = pad_c(scale.reshape(1, cout)).astype(jnp.float32)
    b_p = pad_c(bias.reshape(1, cout)).astype(jnp.float32)

    in_specs = [
        pl.BlockSpec((1,) + xph.shape[1:], lambda j, i: (i, 0, 0, 0)),
        pl.BlockSpec((9, cin, tn), lambda j, i: (0, 0, j)),
        pl.BlockSpec((1, tn), lambda j, i: (0, j)),
        pl.BlockSpec((1, tn), lambda j, i: (0, j)),
    ]
    args = [xph, w_p, s_p, b_p]

    out_itemsize = jnp.dtype(out_dtype).itemsize
    flops = 2 * n * m * 9 * cin * cpad
    bytes_acc = (xph.size * 4 + w_p.size * 2 + (s_p.size + b_p.size) * 4
                 + n * m * cpad * out_itemsize)
    block_bytes = (math.prod(xph.shape[1:]) * 4 + 9 * cin * tn * 2
                   + 2 * tn * 4 + m * tn * out_itemsize)

    if ds is not None:
        xs, wd, sd, bd = ds
        cx = xs.shape[-1]
        xs_p = xs.astype(jnp.bfloat16)
        wd_p = pad_c(wd).astype(jnp.bfloat16)
        sd_p = pad_c(sd.reshape(1, cout)).astype(jnp.float32)
        bd_p = pad_c(bd.reshape(1, cout)).astype(jnp.float32)
        in_specs += [
            pl.BlockSpec((1, m, cx), lambda j, i: (i, 0, 0)),
            pl.BlockSpec((cx, tn), lambda j, i: (0, j)),
            pl.BlockSpec((1, tn), lambda j, i: (0, j)),
            pl.BlockSpec((1, tn), lambda j, i: (0, j)),
        ]
        args += [xs_p, wd_p, sd_p, bd_p]
        kernel = functools.partial(_conv_bn_ds_relu_kernel,
                                   stride=stride, h_out=h_out, w_out=w_out)
        flops += 2 * n * m * cx * cpad
        bytes_acc += xs_p.size * 2 + wd_p.size * 2 + (sd_p.size + bd_p.size) * 4
        block_bytes += m * cx * 2 + cx * tn * 2 + 2 * tn * 4
    elif residual is not None:
        r_p = pad_c(residual).astype(jnp.bfloat16)
        in_specs += [pl.BlockSpec((1, m, tn), lambda j, i: (i, 0, j))]
        args += [r_p]
        kernel = functools.partial(_conv_bn_res_relu_kernel,
                                   stride=stride, h_out=h_out, w_out=w_out)
        bytes_acc += r_p.size * 2
        block_bytes += m * tn * 2
    else:
        kernel = functools.partial(_conv_bn_kernel, stride=stride,
                                   h_out=h_out, w_out=w_out, relu=relu)

    # vmem limit from the actual footprint: double-buffered blocks + f32 acc
    # scratch + headroom, clamped to stay under v7x's 64 MiB per-core VMEM.
    vmem_limit = int(min(64 * 2**20,
                         max(16 * 2**20, 2 * block_bytes + m * tn * 4 + (4 << 20))))

    out = pl.pallas_call(
        kernel,
        grid=(cpad // tn, n),
        in_specs=in_specs,
        out_specs=pl.BlockSpec((1, m, tn), lambda j, i: (i, 0, j)),
        out_shape=jax.ShapeDtypeStruct((n, m, cpad), out_dtype),
        scratch_shapes=[pltpu.VMEM((m, tn), jnp.float32)],
        compiler_params=pltpu.CompilerParams(
            dimension_semantics=("parallel", "parallel"),
            vmem_limit_bytes=vmem_limit),
        cost_estimate=pl.CostEstimate(flops=int(flops), transcendentals=0,
                                      bytes_accessed=int(bytes_acc)),
    )(*args)
    return out


# ---------------------------------------------------------------------------
# Glue: padding / phase split / weight + BN folding (cheap XLA data movement)
# ---------------------------------------------------------------------------
def _phase_split_pad(x_nhwc, stride, pad):
    """Spatially pad and (for stride>1) split into stride phases.

    Returns xph of shape (N, s*s*Hh, Wh, C) such that for tap (ky, kx) the
    kernel's window is xph[n, ((ky%s)*s+kx%s)*Hh + ky//s : ... + h_out,
    kx//s : kx//s + w_out, :] with NO strided in-kernel access.
    """
    n, h, w, c = x_nhwc.shape
    s = stride
    h_out = (h + 2 * pad - 3) // s + 1
    w_out = (w + 2 * pad - 3) // s + 1
    xp = jnp.pad(x_nhwc, ((0, 0), (pad, pad), (pad, pad), (0, 0)))
    hp, wp = h + 2 * pad, w + 2 * pad
    hh, wh = -(-hp // s), -(-wp // s)
    xp = jnp.pad(xp, ((0, 0), (0, hh * s - hp), (0, wh * s - wp), (0, 0)))
    xph = (xp.reshape(n, hh, s, wh, s, c)
             .transpose(0, 2, 4, 1, 3, 5)        # (N, s, s, Hh, Wh, C)
             .reshape(n, s * s * hh, wh, c))
    return xph, h_out, w_out


def _w9(w_oihw):
    cout, cin, kh, kw = w_oihw.shape
    return jnp.transpose(w_oihw, (2, 3, 1, 0)).reshape(kh * kw, cin, cout)


def _bn_fold(gamma, beta, mean, var, eps=1e-5):
    scale = gamma / jnp.sqrt(var + eps)
    bias = beta - mean * scale
    return scale, bias


# ---------------------------------------------------------------------------
# BasicBlock forward
# ---------------------------------------------------------------------------
def basic_block_forward_nhwc(x, params, stride):
    """NHWC-in / NHWC-out (bf16) BasicBlock forward."""
    x = x.astype(jnp.float32)
    n, h, w, cin = x.shape
    cout = params["conv1"].shape[0]

    # conv1 (3x3, stride) + bn1 + relu
    s1, b1 = _bn_fold(*params["bn1"])
    xph1, h1, w1 = _phase_split_pad(x, stride, 1)
    out1 = _fused_conv3x3(xph1, _w9(params["conv1"]), s1, b1,
                          stride=stride, h_out=h1, w_out=w1,
                          relu=True, out_dtype=jnp.float32)   # (N, M1, cpad)
    cpad = out1.shape[-1]
    m1 = h1 * w1

    # conv2 (3x3, stride 1) + bn2 + residual + relu, in ONE kernel.
    # conv2 consumes conv1's zero-padded channel lanes directly; its weight K
    # rows for those lanes are zero, so K is a multiple of 128 for free.
    s2, b2 = _bn_fold(*params["bn2"])
    w2 = _w9(params["conv2"])
    if cpad != cout:
        w2 = jnp.pad(w2, ((0, 0), (0, cpad - cout), (0, 0)))
    xph2, h2, w2o = _phase_split_pad(out1.reshape(n, h1, w1, cpad), 1, 1)

    if "conv_ds" in params:
        xs = x[:, ::stride, ::stride, :].reshape(n, m1, cin)
        wd = jnp.transpose(params["conv_ds"][:, :, 0, 0], (1, 0))  # (Cin, Cout)
        sd, bd = _bn_fold(*params["bn_ds"])
        out2 = _fused_conv3x3(xph2, w2, s2, b2, stride=1, h_out=h2, w_out=w2o,
                              ds=(xs, wd, sd, bd), out_dtype=jnp.bfloat16)
    else:
        assert stride == 1 and cin == cout, (
            "identity residual requires stride == 1 and in_channels == channels")
        residual = x.reshape(n, m1, cin)   # streamed to the kernel in bf16
        out2 = _fused_conv3x3(xph2, w2, s2, b2, stride=1, h_out=h2, w_out=w2o,
                              residual=residual, out_dtype=jnp.bfloat16)

    return out2.reshape(n, h2, w2o, cpad)[..., :cout]   # NHWC bf16


@functools.partial(jax.jit, static_argnames=("stride",))
def basic_block_forward(x_nchw, params, stride):
    """NCHW f32 in / NCHW f32 out (PyTorch module convention)."""
    x = jnp.transpose(x_nchw, (0, 2, 3, 1))
    out = basic_block_forward_nhwc(x, params, stride)
    return jnp.transpose(out.astype(jnp.float32), (0, 3, 1, 2))


# ---------------------------------------------------------------------------
# Pure-JAX reference (f32, HIGHEST precision) for correctness checking
# ---------------------------------------------------------------------------
def reference_forward(x_nchw, params, stride):
    x = jnp.transpose(x_nchw, (0, 2, 3, 1)).astype(jnp.float32)

    def conv(xx, w_oihw, s, pad):
        return lax.conv_general_dilated(
            xx, jnp.transpose(w_oihw, (2, 3, 1, 0)),
            window_strides=(s, s), padding=[(pad, pad), (pad, pad)],
            dimension_numbers=("NHWC", "HWIO", "NHWC"),
            precision=lax.Precision.HIGHEST)

    def bn(xx, p):
        gamma, beta, mean, var = p
        return (xx - mean) / jnp.sqrt(var + 1e-5) * gamma + beta

    out = jax.nn.relu(bn(conv(x, params["conv1"], stride, 1), params["bn1"]))
    out = bn(conv(out, params["conv2"], 1, 1), params["bn2"])
    if "conv_ds" in params:
        xres = bn(conv(x, params["conv_ds"], stride, 0), params["bn_ds"])
    else:
        xres = x
    out = jax.nn.relu(out + xres)
    return jnp.transpose(out, (0, 3, 1, 2))


def _make_params(key, in_channels, channels, stride):
    ks = jax.random.split(key, 16)

    def bn_params(k0, k1, k2, k3, c):
        return (jax.random.normal(k0, (c,)) * 0.1 + 1.0,                 # gamma
                jax.random.normal(k1, (c,)) * 0.1,                        # beta
                jax.random.normal(k2, (c,)) * 0.1,                        # running_mean
                jax.random.uniform(k3, (c,), minval=0.5, maxval=1.5))     # running_var

    params = {
        "conv1": jax.random.normal(ks[0], (channels, in_channels, 3, 3)) * 0.1,
        "bn1": bn_params(ks[1], ks[2], ks[3], ks[4], channels),
        "conv2": jax.random.normal(ks[5], (channels, channels, 3, 3)) * 0.1,
        "bn2": bn_params(ks[6], ks[7], ks[8], ks[9], channels),
    }
    if stride != 1 or in_channels != channels:
        params["conv_ds"] = jax.random.normal(
            ks[10], (channels, in_channels, 1, 1)) * 0.1
        params["bn_ds"] = bn_params(ks[11], ks[12], ks[13], ks[14], channels)
    return params, ks[15]


if __name__ == "__main__":
    key = jax.random.PRNGKey(0)
    # (in_channels, channels, stride, N, H, W):
    #   config 0 exercises the fused 1x1-downsample residual path,
    #   config 1 exercises the identity residual path.
    configs = [
        (4, 8, 2, 2, 16, 16),
        (8, 8, 1, 2, 16, 16),
    ]
    for idx, (cin, cch, stride, n, h, w) in enumerate(configs):
        key, sub = jax.random.split(key)
        params, xkey = _make_params(sub, cin, cch, stride)
        x = jax.random.normal(xkey, (n, cin, h, w), dtype=jnp.float32)

        out = jax.block_until_ready(basic_block_forward(x, params, stride))
        ref = jax.block_until_ready(reference_forward(x, params, stride))

        assert out.shape == ref.shape, (idx, out.shape, ref.shape)
        max_err = float(jnp.max(jnp.abs(out - ref)))
        # bf16 MXU operands / bf16 output store -> loose tolerance vs. f32 ref.
        assert jnp.allclose(out, ref, atol=6e-2, rtol=6e-2), (idx, max_err)

    print("KERNEL_OK")
</pallas_src>

<mosaic_0001>
module attributes {stable_mosaic.version = 11 : i64} {
  func.func @_conv_bn_kernel(%arg0: i32, %arg1: i32, %arg2: memref<1x36x9x4xf32, #tpu.memory_space<vmem>>, %arg3: memref<9x4x128xbf16, #tpu.memory_space<vmem>>, %arg4: memref<1x128xf32, #tpu.memory_space<vmem>>, %arg5: memref<1x128xf32, #tpu.memory_space<vmem>>, %arg6: memref<1x64x128xf32, #tpu.memory_space<vmem>>, %arg7: memref<64x128xf32, #tpu.memory_space<vmem>>) attributes {dimension_semantics = [#tpu.dimension_semantics<parallel>, #tpu.dimension_semantics<parallel>], iteration_bounds = array<i64: 1, 2>, scalar_prefetch = 0 : i64, scratch_operands = 1 : i64, tpu.core_type = #tpu.core_type<tc>, window_params = [{transform_indices = @transform_0, window_bounds = array<i64: 1, 36, 9, 4>}, {transform_indices = @transform_1, window_bounds = array<i64: 9, 4, 128>}, {transform_indices = @transform_2, window_bounds = array<i64: 1, 128>}, {transform_indices = @transform_3, window_bounds = array<i64: 1, 128>}, {transform_indices = @transform_4, window_bounds = array<i64: 1, 64, 128>}]} {
    %c0 = arith.constant 0 : index
    %c0_0 = arith.constant 0 : index
    %c0_1 = arith.constant 0 : index
    %c0_2 = arith.constant 0 : index
    %0 = vector.load %arg2[%c0, %c0_0, %c0_1, %c0_2] : memref<1x36x9x4xf32, #tpu.memory_space<vmem>>, vector<1x8x8x4xf32>
    %1 = vector.shape_cast %0 : vector<1x8x8x4xf32> to vector<8x8x4xf32>
    %2 = vector.shape_cast %1 : vector<8x8x4xf32> to vector<64x4xf32>
    %3 = arith.truncf %2 : vector<64x4xf32> to vector<64x4xbf16>
    %c0_3 = arith.constant 0 : index
    %c0_4 = arith.constant 0 : index
    %c0_5 = arith.constant 0 : index
    %4 = vector.load %arg3[%c0_3, %c0_4, %c0_5] : memref<9x4x128xbf16, #tpu.memory_space<vmem>>, vector<1x4x128xbf16>
    %5 = vector.shape_cast %4 : vector<1x4x128xbf16> to vector<4x128xbf16>
    %cst = arith.constant dense<0.000000e+00> : vector<64x128xf32>
    %6 = tpu.matmul %3, %5, %cst {dimension_numbers = #tpu.dot_dimension_numbers<[1], [0], [0], [1], [0, 0, 1, 1], [], []>} : vector<64x4xbf16>, vector<4x128xbf16>, vector<64x128xf32> -> vector<64x128xf32>
    %c0_6 = arith.constant 0 : index
    %c0_7 = arith.constant 0 : index
    %7 = vector.load %arg7[%c0_6, %c0_7] : memref<64x128xf32, #tpu.memory_space<vmem>>, vector<64x128xf32>
    tpu.vector_store %arg7[%c0_6, %c0_7], %6 {strides = array<i32>} : memref<64x128xf32, #tpu.memory_space<vmem>>, vector<64x128xf32>,
    %c0_8 = arith.constant 0 : index
    %c9 = arith.constant 9 : index
    %c0_9 = arith.constant 0 : index
    %c0_10 = arith.constant 0 : index
    %8 = vector.load %arg2[%c0_8, %c9, %c0_9, %c0_10] : memref<1x36x9x4xf32, #tpu.memory_space<vmem>>, vector<1x8x8x4xf32>
    %9 = vector.shape_cast %8 : vector<1x8x8x4xf32> to vector<8x8x4xf32>
    %10 = vector.shape_cast %9 : vector<8x8x4xf32> to vector<64x4xf32>
    %11 = arith.truncf %10 : vector<64x4xf32> to vector<64x4xbf16>
    %c1 = arith.constant 1 : index
    %c0_11 = arith.constant 0 : index
    %c0_12 = arith.constant 0 : index
    %12 = vector.load %arg3[%c1, %c0_11, %c0_12] : memref<9x4x128xbf16, #tpu.memory_space<vmem>>, vector<1x4x128xbf16>
    %13 = vector.shape_cast %12 : vector<1x4x128xbf16> to vector<4x128xbf16>
    %cst_13 = arith.constant dense<0.000000e+00> : vector<64x128xf32>
    %14 = tpu.matmul %11, %13, %cst_13 {dimension_numbers = #tpu.dot_dimension_numbers<[1], [0], [0], [1], [0, 0, 1, 1], [], []>} : vector<64x4xbf16>, vector<4x128xbf16>, vector<64x128xf32> -> vector<64x128xf32>
    %c0_14 = arith.constant 0 : index
    %c0_15 = arith.constant 0 : index
    %15 = vector.load %arg7[%c0_14, %c0_15] : memref<64x128xf32, #tpu.memory_space<vmem>>, vector<64x128xf32>
    %16 = arith.addf %15, %14 : vector<64x128xf32>
    %c0_16 = arith.constant 0 : index
    %c0_17 = arith.constant 0 : index
    %17 = vector.load %arg7[%c0_16, %c0_17] : memref<64x128xf32, #tpu.memory_space<vmem>>, vector<64x128xf32>
    tpu.vector_store %arg7[%c0_16, %c0_17], %16 {strides = array<i32>} : memref<64x128xf32, #tpu.memory_space<vmem>>, vector<64x128xf32>,
    %c0_18 = arith.constant 0 : index
    %c0_19 = arith.constant 0 : index
    %c1_20 = arith.constant 1 : index
    %c0_21 = arith.constant 0 : index
    %18 = vector.load %arg2[%c0_18, %c0_19, %c1_20, %c0_21] : memref<1x36x9x4xf32, #tpu.memory_space<vmem>>, vector<1x8x8x4xf32>
    %19 = vector.shape_cast %18 : vector<1x8x8x4xf32> to vector<8x8x4xf32>
    %20 = vector.shape_cast %19 : vector<8x8x4xf32> to vector<64x4xf32>
    %21 = arith.truncf %20 : vector<64x4xf32> to vector<64x4xbf16>
    %c2 = arith.constant 2 : index
    %c0_22 = arith.constant 0 : index
    %c0_23 = arith.constant 0 : index
    %22 = vector.load %arg3[%c2, %c0_22, %c0_23] : memref<9x4x128xbf16, #tpu.memory_space<vmem>>, vector<1x4x128xbf16>
    %23 = vector.shape_cast %22 : vector<1x4x128xbf16> to vector<4x128xbf16>
    %cst_24 = arith.constant dense<0.000000e+00> : vector<64x128xf32>
    %24 = tpu.matmul %21, %23, %cst_24 {dimension_numbers = #tpu.dot_dimension_numbers<[1], [0], [0], [1], [0, 0, 1, 1], [], []>} : vector<64x4xbf16>, vector<4x128xbf16>, vector<64x128xf32> -> vector<64x128xf32>
    %c0_25 = arith.constant 0 : index
    %c0_26 = arith.constant 0 : index
    %25 = vector.load %arg7[%c0_25, %c0_26] : memref<64x128xf32, #tpu.memory_space<vmem>>, vector<64x128xf32>
    %26 = arith.addf %25, %24 : vector<64x128xf32>
    %c0_27 = arith.constant 0 : index
    %c0_28 = arith.constant 0 : index
    %27 = vector.load %arg7[%c0_27, %c0_28] : memref<64x128xf32, #tpu.memory_space<vmem>>, vector<64x128xf32>
    tpu.vector_store %arg7[%c0_27, %c0_28], %26 {strides = array<i32>} : memref<64x128xf32, #tpu.memory_space<vmem>>, vector<64x128xf32>,
    %c0_29 = arith.constant 0 : index
    %c18 = arith.constant 18 : index
    %c0_30 = arith.constant 0 : index
    %c0_31 = arith.constant 0 : index
    %28 = vector.load %arg2[%c0_29, %c18, %c0_30, %c0_31] : memref<1x36x9x4xf32, #tpu.memory_space<vmem>>, vector<1x8x8x4xf32>
    %29 = vector.shape_cast %28 : vector<1x8x8x4xf32> to vector<8x8x4xf32>
    %30 = vector.shape_cast %29 : vector<8x8x4xf32> to vector<64x4xf32>
    %31 = arith.truncf %30 : vector<64x4xf32> to vector<64x4xbf16>
    %c3 = arith.constant 3 : index
    %c0_32 = arith.constant 0 : index
    %c0_33 = arith.constant 0 : index
    %32 = vector.load %arg3[%c3, %c0_32, %c0_33] : memref<9x4x128xbf16, #tpu.memory_space<vmem>>, vector<1x4x128xbf16>
    %33 = vector.shape_cast %32 : vector<1x4x128xbf16> to vector<4x128xbf16>
    %cst_34 = arith.constant dense<0.000000e+00> : vector<64x128xf32>
    %34 = tpu.matmul %31, %33, %cst_34 {dimension_numbers = #tpu.dot_dimension_numbers<[1], [0], [0], [1], [0, 0, 1, 1], [], []>} : vector<64x4xbf16>, vector<4x128xbf16>, vector<64x128xf32> -> vector<64x128xf32>
    %c0_35 = arith.constant 0 : index
    %c0_36 = arith.constant 0 : index
    %35 = vector.load %arg7[%c0_35, %c0_36] : memref<64x128xf32, #tpu.memory_space<vmem>>, vector<64x128xf32>
    %36 = arith.addf %35, %34 : vector<64x128xf32>
    %c0_37 = arith.constant 0 : index
    %c0_38 = arith.constant 0 : index
    %37 = vector.load %arg7[%c0_37, %c0_38] : memref<64x128xf32, #tpu.memory_space<vmem>>, vector<64x128xf32>
    tpu.vector_store %arg7[%c0_37, %c0_38], %36 {strides = array<i32>} : memref<64x128xf32, #tpu.memory_space<vmem>>, vector<64x128xf32>,
    %c0_39 = arith.constant 0 : index
    %c27 = arith.constant 27 : index
    %c0_40 = arith.constant 0 : index
    %c0_41 = arith.constant 0 : index
    %38 = vector.load %arg2[%c0_39, %c27, %c0_40, %c0_41] : memref<1x36x9x4xf32, #tpu.memory_space<vmem>>, vector<1x8x8x4xf32>
    %39 = vector.shape_cast %38 : vector<1x8x8x4xf32> to vector<8x8x4xf32>
    %40 = vector.shape_cast %39 : vector<8x8x4xf32> to vector<64x4xf32>
    %41 = arith.truncf %40 : vector<64x4xf32> to vector<64x4xbf16>
    %c4 = arith.constant 4 : index
    %c0_42 = arith.constant 0 : index
    %c0_43 = arith.constant 0 : index
    %42 = vector.load %arg3[%c4, %c0_42, %c0_43] : memref<9x4x128xbf16, #tpu.memory_space<vmem>>, vector<1x4x128xbf16>
    %43 = vector.shape_cast %42 : vector<1x4x128xbf16> to vector<4x128xbf16>
    %cst_44 = arith.constant dense<0.000000e+00> : vector<64x128xf32>
    %44 = tpu.matmul %41, %43, %cst_44 {dimension_numbers = #tpu.dot_dimension_numbers<[1], [0], [0], [1], [0, 0, 1, 1], [], []>} : vector<64x4xbf16>, vector<4x128xbf16>, vector<64x128xf32> -> vector<64x128xf32>
    %c0_45 = arith.constant 0 : index
    %c0_46 = arith.constant 0 : index
    %45 = vector.load %arg7[%c0_45, %c0_46] : memref<64x128xf32, #tpu.memory_space<vmem>>, vector<64x128xf32>
    %46 = arith.addf %45, %44 : vector<64x128xf32>
    %c0_47 = arith.constant 0 : index
    %c0_48 = arith.constant 0 : index
    %47 = vector.load %arg7[%c0_47, %c0_48] : memref<64x128xf32, #tpu.memory_space<vmem>>, vector<64x128xf32>
    tpu.vector_store %arg7[%c0_47, %c0_48], %46 {strides = array<i32>} : memref<64x128xf32, #tpu.memory_space<vmem>>, vector<64x128xf32>,
    %c0_49 = arith.constant 0 : index
    %c18_50 = arith.constant 18 : index
    %c1_51 = arith.constant 1 : index
    %c0_52 = arith.constant 0 : index
    %48 = vector.load %arg2[%c0_49, %c18_50, %c1_51, %c0_52] : memref<1x36x9x4xf32, #tpu.memory_space<vmem>>, vector<1x8x8x4xf32>
    %49 = vector.shape_cast %48 : vector<1x8x8x4xf32> to vector<8x8x4xf32>
    %50 = vector.shape_cast %49 : vector<8x8x4xf32> to vector<64x4xf32>
    %51 = arith.truncf %50 : vector<64x4xf32> to vector<64x4xbf16>
    %c5 = arith.constant 5 : index
    %c0_53 = arith.constant 0 : index
    %c0_54 = arith.constant 0 : index
    %52 = vector.load %arg3[%c5, %c0_53, %c0_54] : memref<9x4x128xbf16, #tpu.memory_space<vmem>>, vector<1x4x128xbf16>
    %53 = vector.shape_cast %52 : vector<1x4x128xbf16> to vector<4x128xbf16>
    %cst_55 = arith.constant dense<0.000000e+00> : vector<64x128xf32>
    %54 = tpu.matmul %51, %53, %cst_55 {dimension_numbers = #tpu.dot_dimension_numbers<[1], [0], [0], [1], [0, 0, 1, 1], [], []>} : vector<64x4xbf16>, vector<4x128xbf16>, vector<64x128xf32> -> vector<64x128xf32>
    %c0_56 = arith.constant 0 : index
    %c0_57 = arith.constant 0 : index
    %55 = vector.load %arg7[%c0_56, %c0_57] : memref<64x128xf32, #tpu.memory_space<vmem>>, vector<64x128xf32>
    %56 = arith.addf %55, %54 : vector<64x128xf32>
    %c0_58 = arith.constant 0 : index
    %c0_59 = arith.constant 0 : index
    %57 = vector.load %arg7[%c0_58, %c0_59] : memref<64x128xf32, #tpu.memory_space<vmem>>, vector<64x128xf32>
    tpu.vector_store %arg7[%c0_58, %c0_59], %56 {strides = array<i32>} : memref<64x128xf32, #tpu.memory_space<vmem>>, vector<64x128xf32>,
    %c0_60 = arith.constant 0 : index
    %c1_61 = arith.constant 1 : index
    %c0_62 = arith.constant 0 : index
    %c0_63 = arith.constant 0 : index
    %58 = vector.load %arg2[%c0_60, %c1_61, %c0_62, %c0_63] : memref<1x36x9x4xf32, #tpu.memory_space<vmem>>, vector<1x8x8x4xf32>
    %59 = vector.shape_cast %58 : vector<1x8x8x4xf32> to vector<8x8x4xf32>
    %60 = vector.shape_cast %59 : vector<8x8x4xf32> to vector<64x4xf32>
    %61 = arith.truncf %60 : vector<64x4xf32> to vector<64x4xbf16>
    %c6 = arith.constant 6 : index
    %c0_64 = arith.constant 0 : index
    %c0_65 = arith.constant 0 : index
    %62 = vector.load %arg3[%c6, %c0_64, %c0_65] : memref<9x4x128xbf16, #tpu.memory_space<vmem>>, vector<1x4x128xbf16>
    %63 = vector.shape_cast %62 : vector<1x4x128xbf16> to vector<4x128xbf16>
    %cst_66 = arith.constant dense<0.000000e+00> : vector<64x128xf32>
    %64 = tpu.matmul %61, %63, %cst_66 {dimension_numbers = #tpu.dot_dimension_numbers<[1], [0], [0], [1], [0, 0, 1, 1], [], []>} : vector<64x4xbf16>, vector<4x128xbf16>, vector<64x128xf32> -> vector<64x128xf32>
    %c0_67 = arith.constant 0 : index
    %c0_68 = arith.constant 0 : index
    %65 = vector.load %arg7[%c0_67, %c0_68] : memref<64x128xf32, #tpu.memory_space<vmem>>, vector<64x128xf32>
    %66 = arith.addf %65, %64 : vector<64x128xf32>
    %c0_69 = arith.constant 0 : index
    %c0_70 = arith.constant 0 : index
    %67 = vector.load %arg7[%c0_69, %c0_70] : memref<64x128xf32, #tpu.memory_space<vmem>>, vector<64x128xf32>
    tpu.vector_store %arg7[%c0_69, %c0_70], %66 {strides = array<i32>} : memref<64x128xf32, #tpu.memory_space<vmem>>, vector<64x128xf32>,
    %c0_71 = arith.constant 0 : index
    %c10 = arith.constant 10 : index
    %c0_72 = arith.constant 0 : index
    %c0_73 = arith.constant 0 : index
    %68 = vector.load %arg2[%c0_71, %c10, %c0_72, %c0_73] : memref<1x36x9x4xf32, #tpu.memory_space<vmem>>, vector<1x8x8x4xf32>
    %69 = vector.shape_cast %68 : vector<1x8x8x4xf32> to vector<8x8x4xf32>
    %70 = vector.shape_cast %69 : vector<8x8x4xf32> to vector<64x4xf32>
    %71 = arith.truncf %70 : vector<64x4xf32> to vector<64x4xbf16>
    %c7 = arith.constant 7 : index
    %c0_74 = arith.constant 0 : index
    %c0_75 = arith.constant 0 : index
    %72 = vector.load %arg3[%c7, %c0_74, %c0_75] : memref<9x4x128xbf16, #tpu.memory_space<vmem>>, vector<1x4x128xbf16>
    %73 = vector.shape_cast %72 : vector<1x4x128xbf16> to vector<4x128xbf16>
    %cst_76 = arith.constant dense<0.000000e+00> : vector<64x128xf32>
    %74 = tpu.matmul %71, %73, %cst_76 {dimension_numbers = #tpu.dot_dimension_numbers<[1], [0], [0], [1], [0, 0, 1, 1], [], []>} : vector<64x4xbf16>, vector<4x128xbf16>, vector<64x128xf32> -> vector<64x128xf32>
    %c0_77 = arith.constant 0 : index
    %c0_78 = arith.constant 0 : index
    %75 = vector.load %arg7[%c0_77, %c0_78] : memref<64x128xf32, #tpu.memory_space<vmem>>, vector<64x128xf32>
    %76 = arith.addf %75, %74 : vector<64x128xf32>
    %c0_79 = arith.constant 0 : index
    %c0_80 = arith.constant 0 : index
    %77 = vector.load %arg7[%c0_79, %c0_80] : memref<64x128xf32, #tpu.memory_space<vmem>>, vector<64x128xf32>
    tpu.vector_store %arg7[%c0_79, %c0_80], %76 {strides = array<i32>} : memref<64x128xf32, #tpu.memory_space<vmem>>, vector<64x128xf32>,
    %c0_81 = arith.constant 0 : index
    %c1_82 = arith.constant 1 : index
    %c1_83 = arith.constant 1 : index
    %c0_84 = arith.constant 0 : index
    %78 = vector.load %arg2[%c0_81, %c1_82, %c1_83, %c0_84] : memref<1x36x9x4xf32, #tpu.memory_space<vmem>>, vector<1x8x8x4xf32>
    %79 = vector.shape_cast %78 : vector<1x8x8x4xf32> to vector<8x8x4xf32>
    %80 = vector.shape_cast %79 : vector<8x8x4xf32> to vector<64x4xf32>
    %81 = arith.truncf %80 : vector<64x4xf32> to vector<64x4xbf16>
    %c8 = arith.constant 8 : index
    %c0_85 = arith.constant 0 : index
    %c0_86 = arith.constant 0 : index
    %82 = vector.load %arg3[%c8, %c0_85, %c0_86] : memref<9x4x128xbf16, #tpu.memory_space<vmem>>, vector<1x4x128xbf16>
    %83 = vector.shape_cast %82 : vector<1x4x128xbf16> to vector<4x128xbf16>
    %cst_87 = arith.constant dense<0.000000e+00> : vector<64x128xf32>
    %84 = tpu.matmul %81, %83, %cst_87 {dimension_numbers = #tpu.dot_dimension_numbers<[1], [0], [0], [1], [0, 0, 1, 1], [], []>} : vector<64x4xbf16>, vector<4x128xbf16>, vector<64x128xf32> -> vector<64x128xf32>
    %c0_88 = arith.constant 0 : index
    %c0_89 = arith.constant 0 : index
    %85 = vector.load %arg7[%c0_88, %c0_89] : memref<64x128xf32, #tpu.memory_space<vmem>>, vector<64x128xf32>
    %86 = arith.addf %85, %84 : vector<64x128xf32>
    %c0_90 = arith.constant 0 : index
    %c0_91 = arith.constant 0 : index
    %87 = vector.load %arg7[%c0_90, %c0_91] : memref<64x128xf32, #tpu.memory_space<vmem>>, vector<64x128xf32>
    tpu.vector_store %arg7[%c0_90, %c0_91], %86 {strides = array<i32>} : memref<64x128xf32, #tpu.memory_space<vmem>>, vector<64x128xf32>,
    %c0_92 = arith.constant 0 : index
    %c0_93 = arith.constant 0 : index
    %88 = vector.load %arg7[%c0_92, %c0_93] : memref<64x128xf32, #tpu.memory_space<vmem>>, vector<64x128xf32>
    %c0_94 = arith.constant 0 : index
    %c0_95 = arith.constant 0 : index
    %89 = vector.load %arg4[%c0_94, %c0_95] : memref<1x128xf32, #tpu.memory_space<vmem>>, vector<1x128xf32>
    %90 = vector.broadcast %89 : vector<1x128xf32> to vector<64x128xf32>
    %91 = arith.mulf %88, %90 : vector<64x128xf32>
    %c0_96 = arith.constant 0 : index
    %c0_97 = arith.constant 0 : index
    %92 = vector.load %arg5[%c0_96, %c0_97] : memref<1x128xf32, #tpu.memory_space<vmem>>, vector<1x128xf32>
    %93 = vector.broadcast %92 : vector<1x128xf32> to vector<64x128xf32>
    %94 = arith.addf %91, %93 : vector<64x128xf32>
    %cst_98 = arith.constant 0.000000e+00 : f32
    %95 = vector.broadcast %cst_98 : f32 to vector<64x128xf32>
    %96 = arith.maximumf %94, %95 : vector<64x128xf32>
    %c0_99 = arith.constant 0 : index
    %c0_100 = arith.constant 0 : index
    %c0_101 = arith.constant 0 : index
    %97 = vector.load %arg6[%c0_99, %c0_100, %c0_101] : memref<1x64x128xf32, #tpu.memory_space<vmem>>, vector<1x64x128xf32>
    %98 = vector.shape_cast %97 : vector<1x64x128xf32> to vector<64x128xf32>
    %99 = vector.shape_cast %96 : vector<64x128xf32> to vector<1x64x128xf32>
    tpu.vector_store %arg6[%c0_99, %c0_100, %c0_101], %99 {strides = array<i32>} : memref<1x64x128xf32, #tpu.memory_space<vmem>>, vector<1x64x128xf32>,
    return
  }
  func.func @transform_0(%arg0: i32, %arg1: i32) -> (i32, i32, i32, i32) {
    %c0_i32 = arith.constant 0 : i32
    %c0_i32_0 = arith.constant 0 : i32
    %c0_i32_1 = arith.constant 0 : i32
    %c0_i32_2 = arith.constant 0 : i32
    return %arg1, %c0_i32, %c0_i32_0, %c0_i32_1 : i32, i32, i32, i32
  }
  func.func @transform_1(%arg0: i32, %arg1: i32) -> (i32, i32, i32) {
    %c0_i32 = arith.constant 0 : i32
    %c0_i32_0 = arith.constant 0 : i32
    %c0_i32_1 = arith.constant 0 : i32
    return %c0_i32, %c0_i32_0, %arg0 : i32, i32, i32
  }
  func.func @transform_2(%arg0: i32, %arg1: i32) -> (i32, i32) {
    %c0_i32 = arith.constant 0 : i32
    %c0_i32_0 = arith.constant 0 : i32
    return %c0_i32, %arg0 : i32, i32
  }
  func.func @transform_3(%arg0: i32, %arg1: i32) -> (i32, i32) {
    %c0_i32 = arith.constant 0 : i32
    %c0_i32_0 = arith.constant 0 : i32
    return %c0_i32, %arg0 : i32, i32
  }
  func.func @transform_4(%arg0: i32, %arg1: i32) -> (i32, i32, i32) {
    %c0_i32 = arith.constant 0 : i32
    %c0_i32_0 = arith.constant 0 : i32
    return %arg1, %c0_i32, %arg0 : i32, i32, i32
  }
}

module attributes {stable_mosaic.version = 11 : i64} {
  func.func @_conv_bn_ds_relu_kernel(%arg0: i32, %arg1: i32, %arg2: memref<1x10x10x128xf32, #tpu.memory_space<vmem>>, %arg3: memref<9x128x128xbf16, #tpu.memory_space<vmem>>, %arg4: memref<1x128xf32, #tpu.memory_space<vmem>>, %arg5: memref<1x128xf32, #tpu.memory_space<vmem>>, %arg6: memref<1x64x4xbf16, #tpu.memory_space<vmem>>, %arg7: memref<4x128xbf16, #tpu.memory_space<vmem>>, %arg8: memref<1x128xf32, #tpu.memory_space<vmem>>, %arg9: memref<1x128xf32, #tpu.memory_space<vmem>>, %arg10: memref<1x64x128xbf16, #tpu.memory_space<vmem>>, %arg11: memref<64x128xf32, #tpu.memory_space<vmem>>) attributes {dimension_semantics = [#tpu.dimension_semantics<parallel>, #tpu.dimension_semantics<parallel>], iteration_bounds = array<i64: 1, 2>, scalar_prefetch = 0 : i64, scratch_operands = 1 : i64, tpu.core_type = #tpu.core_type<tc>, window_params = [{transform_indices = @transform_0, window_bounds = array<i64: 1, 10, 10, 128>}, {transform_indices = @transform_1, window_bounds = array<i64: 9, 128, 128>}, {transform_indices = @transform_2, window_bounds = array<i64: 1, 128>}, {transform_indices = @transform_3, window_bounds = array<i64: 1, 128>}, {transform_indices = @transform_4, window_bounds = array<i64: 1, 64, 4>}, {transform_indices = @transform_5, window_bounds = array<i64: 4, 128>}, {transform_indices = @transform_6, window_bounds = array<i64: 1, 128>}, {transform_indices = @transform_7, window_bounds = array<i64: 1, 128>}, {transform_indices = @transform_8, window_bounds = array<i64: 1, 64, 128>}]} {
    %c0 = arith.constant 0 : index
    %c0_0 = arith.constant 0 : index
    %c0_1 = arith.constant 0 : index
    %c0_2 = arith.constant 0 : index
    %0 = vector.load %arg2[%c0, %c0_0, %c0_1, %c0_2] : memref<1x10x10x128xf32, #tpu.memory_space<vmem>>, vector<1x8x8x128xf32>
    %1 = vector.shape_cast %0 : vector<1x8x8x128xf32> to vector<8x8x128xf32>
    %2 = vector.shape_cast %1 : vector<8x8x128xf32> to vector<64x128xf32>
    %3 = arith.truncf %2 : vector<64x128xf32> to vector<64x128xbf16>
    %c0_3 = arith.constant 0 : index
    %c0_4 = arith.constant 0 : index
    %c0_5 = arith.constant 0 : index
    %4 = vector.load %arg3[%c0_3, %c0_4, %c0_5] : memref<9x128x128xbf16, #tpu.memory_space<vmem>>, vector<1x128x128xbf16>
    %5 = vector.shape_cast %4 : vector<1x128x128xbf16> to vector<128x128xbf16>
    %cst = arith.constant dense<0.000000e+00> : vector<64x128xf32>
    %6 = tpu.matmul %3, %5, %cst {dimension_numbers = #tpu.dot_dimension_numbers<[1], [0], [0], [1], [0, 0, 1, 1], [], []>} : vector<64x128xbf16>, vector<128x128xbf16>, vector<64x128xf32> -> vector<64x128xf32>
    %c0_6 = arith.constant 0 : index
    %c0_7 = arith.constant 0 : index
    %7 = vector.load %arg11[%c0_6, %c0_7] : memref<64x128xf32, #tpu.memory_space<vmem>>, vector<64x128xf32>
    tpu.vector_store %arg11[%c0_6, %c0_7], %6 {strides = array<i32>} : memref<64x128xf32, #tpu.memory_space<vmem>>, vector<64x128xf32>,
    %c0_8 = arith.constant 0 : index
    %c0_9 = arith.constant 0 : index
    %c1 = arith.constant 1 : index
    %c0_10 = arith.constant 0 : index
    %8 = vector.load %arg2[%c0_8, %c0_9, %c1, %c0_10] : memref<1x10x10x128xf32, #tpu.memory_space<vmem>>, vector<1x8x8x128xf32>
    %9 = vector.shape_cast %8 : vector<1x8x8x128xf32> to vector<8x8x128xf32>
    %10 = vector.shape_cast %9 : vector<8x8x128xf32> to vector<64x128xf32>
    %11 = arith.truncf %10 : vector<64x128xf32> to vector<64x128xbf16>
    %c1_11 = arith.constant 1 : index
    %c0_12 = arith.constant 0 : index
    %c0_13 = arith.constant 0 : index
    %12 = vector.load %arg3[%c1_11, %c0_12, %c0_13] : memref<9x128x128xbf16, #tpu.memory_space<vmem>>, vector<1x128x128xbf16>
    %13 = vector.shape_cast %12 : vector<1x128x128xbf16> to vector<128x128xbf16>
    %cst_14 = arith.constant dense<0.000000e+00> : vector<64x128xf32>
    %14 = tpu.matmul %11, %13, %cst_14 {dimension_numbers = #tpu.dot_dimension_numbers<[1], [0], [0], [1], [0, 0, 1, 1], [], []>} : vector<64x128xbf16>, vector<128x128xbf16>, vector<64x128xf32> -> vector<64x128xf32>
    %c0_15 = arith.constant 0 : index
    %c0_16 = arith.constant 0 : index
    %15 = vector.load %arg11[%c0_15, %c0_16] : memref<64x128xf32, #tpu.memory_space<vmem>>, vector<64x128xf32>
    %16 = arith.addf %15, %14 : vector<64x128xf32>
    %c0_17 = arith.constant 0 : index
    %c0_18 = arith.constant 0 : index
    %17 = vector.load %arg11[%c0_17, %c0_18] : memref<64x128xf32, #tpu.memory_space<vmem>>, vector<64x128xf32>
    tpu.vector_store %arg11[%c0_17, %c0_18], %16 {strides = array<i32>} : memref<64x128xf32, #tpu.memory_space<vmem>>, vector<64x128xf32>,
    %c0_19 = arith.constant 0 : index
    %c0_20 = arith.constant 0 : index
    %c2 = arith.constant 2 : index
    %c0_21 = arith.constant 0 : index
    %18 = vector.load %arg2[%c0_19, %c0_20, %c2, %c0_21] : memref<1x10x10x128xf32, #tpu.memory_space<vmem>>, vector<1x8x8x128xf32>
    %19 = vector.shape_cast %18 : vector<1x8x8x128xf32> to vector<8x8x128xf32>
    %20 = vector.shape_cast %19 : vector<8x8x128xf32> to vector<64x128xf32>
    %21 = arith.truncf %20 : vector<64x128xf32> to vector<64x128xbf16>
    %c2_22 = arith.constant 2 : index
    %c0_23 = arith.constant 0 : index
    %c0_24 = arith.constant 0 : index
    %22 = vector.load %arg3[%c2_22, %c0_23, %c0_24] : memref<9x128x128xbf16, #tpu.memory_space<vmem>>, vector<1x128x128xbf16>
    %23 = vector.shape_cast %22 : vector<1x128x128xbf16> to vector<128x128xbf16>
    %cst_25 = arith.constant dense<0.000000e+00> : vector<64x128xf32>
    %24 = tpu.matmul %21, %23, %cst_25 {dimension_numbers = #tpu.dot_dimension_numbers<[1], [0], [0], [1], [0, 0, 1, 1], [], []>} : vector<64x128xbf16>, vector<128x128xbf16>, vector<64x128xf32> -> vector<64x128xf32>
    %c0_26 = arith.constant 0 : index
    %c0_27 = arith.constant 0 : index
    %25 = vector.load %arg11[%c0_26, %c0_27] : memref<64x128xf32, #tpu.memory_space<vmem>>, vector<64x128xf32>
    %26 = arith.addf %25, %24 : vector<64x128xf32>
    %c0_28 = arith.constant 0 : index
    %c0_29 = arith.constant 0 : index
    %27 = vector.load %arg11[%c0_28, %c0_29] : memref<64x128xf32, #tpu.memory_space<vmem>>, vector<64x128xf32>
    tpu.vector_store %arg11[%c0_28, %c0_29], %26 {strides = array<i32>} : memref<64x128xf32, #tpu.memory_space<vmem>>, vector<64x128xf32>,
    %c0_30 = arith.constant 0 : index
    %c1_31 = arith.constant 1 : index
    %c0_32 = arith.constant 0 : index
    %c0_33 = arith.constant 0 : index
    %28 = vector.load %arg2[%c0_30, %c1_31, %c0_32, %c0_33] : memref<1x10x10x128xf32, #tpu.memory_space<vmem>>, vector<1x8x8x128xf32>
    %29 = vector.shape_cast %28 : vector<1x8x8x128xf32> to vector<8x8x128xf32>
    %30 = vector.shape_cast %29 : vector<8x8x128xf32> to vector<64x128xf32>
    %31 = arith.truncf %30 : vector<64x128xf32> to vector<64x128xbf16>
    %c3 = arith.constant 3 : index
    %c0_34 = arith.constant 0 : index
    %c0_35 = arith.constant 0 : index
    %32 = vector.load %arg3[%c3, %c0_34, %c0_35] : memref<9x128x128xbf16, #tpu.memory_space<vmem>>, vector<1x128x128xbf16>
    %33 = vector.shape_cast %32 : vector<1x128x128xbf16> to vector<128x128xbf16>
    %cst_36 = arith.constant dense<0.000000e+00> : vector<64x128xf32>
    %34 = tpu.matmul %31, %33, %cst_36 {dimension_numbers = #tpu.dot_dimension_numbers<[1], [0], [0], [1], [0, 0, 1, 1], [], []>} : vector<64x128xbf16>, vector<128x128xbf16>, vector<64x128xf32> -> vector<64x128xf32>
    %c0_37 = arith.constant 0 : index
    %c0_38 = arith.constant 0 : index
    %35 = vector.load %arg11[%c0_37, %c0_38] : memref<64x128xf32, #tpu.memory_space<vmem>>, vector<64x128xf32>
    %36 = arith.addf %35, %34 : vector<64x128xf32>
    %c0_39 = arith.constant 0 : index
    %c0_40 = arith.constant 0 : index
    %37 = vector.load %arg11[%c0_39, %c0_40] : memref<64x128xf32, #tpu.memory_space<vmem>>, vector<64x128xf32>
    tpu.vector_store %arg11[%c0_39, %c0_40], %36 {strides = array<i32>} : memref<64x128xf32, #tpu.memory_space<vmem>>, vector<64x128xf32>,
    %c0_41 = arith.constant 0 : index
    %c1_42 = arith.constant 1 : index
    %c1_43 = arith.constant 1 : index
    %c0_44 = arith.constant 0 : index
    %38 = vector.load %arg2[%c0_41, %c1_42, %c1_43, %c0_44] : memref<1x10x10x128xf32, #tpu.memory_space<vmem>>, vector<1x8x8x128xf32>
    %39 = vector.shape_cast %38 : vector<1x8x8x128xf32> to vector<8x8x128xf32>
    %40 = vector.shape_cast %39 : vector<8x8x128xf32> to vector<64x128xf32>
    %41 = arith.truncf %40 : vector<64x128xf32> to vector<64x128xbf16>
    %c4 = arith.constant 4 : index
    %c0_45 = arith.constant 0 : index
    %c0_46 = arith.constant 0 : index
    %42 = vector.load %arg3[%c4, %c0_45, %c0_46] : memref<9x128x128xbf16, #tpu.memory_space<vmem>>, vector<1x128x128xbf16>
    %43 = vector.shape_cast %42 : vector<1x128x128xbf16> to vector<128x128xbf16>
    %cst_47 = arith.constant dense<0.000000e+00> : vector<64x128xf32>
    %44 = tpu.matmul %41, %43, %cst_47 {dimension_numbers = #tpu.dot_dimension_numbers<[1], [0], [0], [1], [0, 0, 1, 1], [], []>} : vector<64x128xbf16>, vector<128x128xbf16>, vector<64x128xf32> -> vector<64x128xf32>
    %c0_48 = arith.constant 0 : index
    %c0_49 = arith.constant 0 : index
    %45 = vector.load %arg11[%c0_48, %c0_49] : memref<64x128xf32, #tpu.memory_space<vmem>>, vector<64x128xf32>
    %46 = arith.addf %45, %44 : vector<64x128xf32>
    %c0_50 = arith.constant 0 : index
    %c0_51 = arith.constant 0 : index
    %47 = vector.load %arg11[%c0_50, %c0_51] : memref<64x128xf32, #tpu.memory_space<vmem>>, vector<64x128xf32>
    tpu.vector_store %arg11[%c0_50, %c0_51], %46 {strides = array<i32>} : memref<64x128xf32, #tpu.memory_space<vmem>>, vector<64x128xf32>,
    %c0_52 = arith.constant 0 : index
    %c1_53 = arith.constant 1 : index
    %c2_54 = arith.constant 2 : index
    %c0_55 = arith.constant 0 : index
    %48 = vector.load %arg2[%c0_52, %c1_53, %c2_54, %c0_55] : memref<1x10x10x128xf32, #tpu.memory_space<vmem>>, vector<1x8x8x128xf32>
    %49 = vector.shape_cast %48 : vector<1x8x8x128xf32> to vector<8x8x128xf32>
    %50 = vector.shape_cast %49 : vector<8x8x128xf32> to vector<64x128xf32>
    %51 = arith.truncf %50 : vector<64x128xf32> to vector<64x128xbf16>
    %c5 = arith.constant 5 : index
    %c0_56 = arith.constant 0 : index
    %c0_57 = arith.constant 0 : index
    %52 = vector.load %arg3[%c5, %c0_56, %c0_57] : memref<9x128x128xbf16, #tpu.memory_space<vmem>>, vector<1x128x128xbf16>
    %53 = vector.shape_cast %52 : vector<1x128x128xbf16> to vector<128x128xbf16>
    %cst_58 = arith.constant dense<0.000000e+00> : vector<64x128xf32>
    %54 = tpu.matmul %51, %53, %cst_58 {dimension_numbers = #tpu.dot_dimension_numbers<[1], [0], [0], [1], [0, 0, 1, 1], [], []>} : vector<64x128xbf16>, vector<128x128xbf16>, vector<64x128xf32> -> vector<64x128xf32>
    %c0_59 = arith.constant 0 : index
    %c0_60 = arith.constant 0 : index
    %55 = vector.load %arg11[%c0_59, %c0_60] : memref<64x128xf32, #tpu.memory_space<vmem>>, vector<64x128xf32>
    %56 = arith.addf %55, %54 : vector<64x128xf32>
    %c0_61 = arith.constant 0 : index
    %c0_62 = arith.constant 0 : index
    %57 = vector.load %arg11[%c0_61, %c0_62] : memref<64x128xf32, #tpu.memory_space<vmem>>, vector<64x128xf32>
    tpu.vector_store %arg11[%c0_61, %c0_62], %56 {strides = array<i32>} : memref<64x128xf32, #tpu.memory_space<vmem>>, vector<64x128xf32>,
    %c0_63 = arith.constant 0 : index
    %c2_64 = arith.constant 2 : index
    %c0_65 = arith.constant 0 : index
    %c0_66 = arith.constant 0 : index
    %58 = vector.load %arg2[%c0_63, %c2_64, %c0_65, %c0_66] : memref<1x10x10x128xf32, #tpu.memory_space<vmem>>, vector<1x8x8x128xf32>
    %59 = vector.shape_cast %58 : vector<1x8x8x128xf32> to vector<8x8x128xf32>
    %60 = vector.shape_cast %59 : vector<8x8x128xf32> to vector<64x128xf32>
    %61 = arith.truncf %60 : vector<64x128xf32> to vector<64x128xbf16>
    %c6 = arith.constant 6 : index
    %c0_67 = arith.constant 0 : index
    %c0_68 = arith.constant 0 : index
    %62 = vector.load %arg3[%c6, %c0_67, %c0_68] : memref<9x128x128xbf16, #tpu.memory_space<vmem>>, vector<1x128x128xbf16>
    %63 = vector.shape_cast %62 : vector<1x128x128xbf16> to vector<128x128xbf16>
    %cst_69 = arith.constant dense<0.000000e+00> : vector<64x128xf32>
    %64 = tpu.matmul %61, %63, %cst_69 {dimension_numbers = #tpu.dot_dimension_numbers<[1], [0], [0], [1], [0, 0, 1, 1], [], []>} : vector<64x128xbf16>, vector<128x128xbf16>, vector<64x128xf32> -> vector<64x128xf32>
    %c0_70 = arith.constant 0 : index
    %c0_71 = arith.constant 0 : index
    %65 = vector.load %arg11[%c0_70, %c0_71] : memref<64x128xf32, #tpu.memory_space<vmem>>, vector<64x128xf32>
    %66 = arith.addf %65, %64 : vector<64x128xf32>
    %c0_72 = arith.constant 0 : index
    %c0_73 = arith.constant 0 : index
    %67 = vector.load %arg11[%c0_72, %c0_73] : memref<64x128xf32, #tpu.memory_space<vmem>>, vector<64x128xf32>
    tpu.vector_store %arg11[%c0_72, %c0_73], %66 {strides = array<i32>} : memref<64x128xf32, #tpu.memory_space<vmem>>, vector<64x128xf32>,
    %c0_74 = arith.constant 0 : index
    %c2_75 = arith.constant 2 : index
    %c1_76 = arith.constant 1 : index
    %c0_77 = arith.constant 0 : index
    %68 = vector.load %arg2[%c0_74, %c2_75, %c1_76, %c0_77] : memref<1x10x10x128xf32, #tpu.memory_space<vmem>>, vector<1x8x8x128xf32>
    %69 = vector.shape_cast %68 : vector<1x8x8x128xf32> to vector<8x8x128xf32>
    %70 = vector.shape_cast %69 : vector<8x8x128xf32> to vector<64x128xf32>
    %71 = arith.truncf %70 : vector<64x128xf32> to vector<64x128xbf16>
    %c7 = arith.constant 7 : index
    %c0_78 = arith.constant 0 : index
    %c0_79 = arith.constant 0 : index
    %72 = vector.load %arg3[%c7, %c0_78, %c0_79] : memref<9x128x128xbf16, #tpu.memory_space<vmem>>, vector<1x128x128xbf16>
    %73 = vector.shape_cast %72 : vector<1x128x128xbf16> to vector<128x128xbf16>
    %cst_80 = arith.constant dense<0.000000e+00> : vector<64x128xf32>
    %74 = tpu.matmul %71, %73, %cst_80 {dimension_numbers = #tpu.dot_dimension_numbers<[1], [0], [0], [1], [0, 0, 1, 1], [], []>} : vector<64x128xbf16>, vector<128x128xbf16>, vector<64x128xf32> -> vector<64x128xf32>
    %c0_81 = arith.constant 0 : index
    %c0_82 = arith.constant 0 : index
    %75 = vector.load %arg11[%c0_81, %c0_82] : memref<64x128xf32, #tpu.memory_space<vmem>>, vector<64x128xf32>
    %76 = arith.addf %75, %74 : vector<64x128xf32>
    %c0_83 = arith.constant 0 : index
    %c0_84 = arith.constant 0 : index
    %77 = vector.load %arg11[%c0_83, %c0_84] : memref<64x128xf32, #tpu.memory_space<vmem>>, vector<64x128xf32>
    tpu.vector_store %arg11[%c0_83, %c0_84], %76 {strides = array<i32>} : memref<64x128xf32, #tpu.memory_space<vmem>>, vector<64x128xf32>,
    %c0_85 = arith.constant 0 : index
    %c2_86 = arith.constant 2 : index
    %c2_87 = arith.constant 2 : index
    %c0_88 = arith.constant 0 : index
    %78 = vector.load %arg2[%c0_85, %c2_86, %c2_87, %c0_88] : memref<1x10x10x128xf32, #tpu.memory_space<vmem>>, vector<1x8x8x128xf32>
    %79 = vector.shape_cast %78 : vector<1x8x8x128xf32> to vector<8x8x128xf32>
    %80 = vector.shape_cast %79 : vector<8x8x128xf32> to vector<64x128xf32>
    %81 = arith.truncf %80 : vector<64x128xf32> to vector<64x128xbf16>
    %c8 = arith.constant 8 : index
    %c0_89 = arith.constant 0 : index
    %c0_90 = arith.constant 0 : index
    %82 = vector.load %arg3[%c8, %c0_89, %c0_90] : memref<9x128x128xbf16, #tpu.memory_space<vmem>>, vector<1x128x128xbf16>
    %83 = vector.shape_cast %82 : vector<1x128x128xbf16> to vector<128x128xbf16>
    %cst_91 = arith.constant dense<0.000000e+00> : vector<64x128xf32>
    %84 = tpu.matmul %81, %83, %cst_91 {dimension_numbers = #tpu.dot_dimension_numbers<[1], [0], [0], [1], [0, 0, 1, 1], [], []>} : vector<64x128xbf16>, vector<128x128xbf16>, vector<64x128xf32> -> vector<64x128xf32>
    %c0_92 = arith.constant 0 : index
    %c0_93 = arith.constant 0 : index
    %85 = vector.load %arg11[%c0_92, %c0_93] : memref<64x128xf32, #tpu.memory_space<vmem>>, vector<64x128xf32>
    %86 = arith.addf %85, %84 : vector<64x128xf32>
    %c0_94 = arith.constant 0 : index
    %c0_95 = arith.constant 0 : index
    %87 = vector.load %arg11[%c0_94, %c0_95] : memref<64x128xf32, #tpu.memory_space<vmem>>, vector<64x128xf32>
    tpu.vector_store %arg11[%c0_94, %c0_95], %86 {strides = array<i32>} : memref<64x128xf32, #tpu.memory_space<vmem>>, vector<64x128xf32>,
    %c0_96 = arith.constant 0 : index
    %c0_97 = arith.constant 0 : index
    %c0_98 = arith.constant 0 : index
    %88 = vector.load %arg6[%c0_96, %c0_97, %c0_98] : memref<1x64x4xbf16, #tpu.memory_space<vmem>>, vector<1x64x4xbf16>
    %89 = vector.shape_cast %88 : vector<1x64x4xbf16> to vector<64x4xbf16>
    %c0_99 = arith.constant 0 : index
    %c0_100 = arith.constant 0 : index
    %90 = vector.load %arg7[%c0_99, %c0_100] : memref<4x128xbf16, #tpu.memory_space<vmem>>, vector<4x128xbf16>
    %cst_101 = arith.constant dense<0.000000e+00> : vector<64x128xf32>
    %91 = tpu.matmul %89, %90, %cst_101 {dimension_numbers = #tpu.dot_dimension_numbers<[1], [0], [0], [1], [0, 0, 1, 1], [], []>} : vector<64x4xbf16>, vector<4x128xbf16>, vector<64x128xf32> -> vector<64x128xf32>
    %c0_102 = arith.constant 0 : index
    %c0_103 = arith.constant 0 : index
    %92 = vector.load %arg8[%c0_102, %c0_103] : memref<1x128xf32, #tpu.memory_space<vmem>>, vector<1x128xf32>
    %93 = vector.broadcast %92 : vector<1x128xf32> to vector<64x128xf32>
    %94 = arith.mulf %91, %93 : vector<64x128xf32>
    %c0_104 = arith.constant 0 : index
    %c0_105 = arith.constant 0 : index
    %95 = vector.load %arg9[%c0_104, %c0_105] : memref<1x128xf32, #tpu.memory_space<vmem>>, vector<1x128xf32>
    %96 = vector.broadcast %95 : vector<1x128xf32> to vector<64x128xf32>
    %97 = arith.addf %94, %96 : vector<64x128xf32>
    %c0_106 = arith.constant 0 : index
    %c0_107 = arith.constant 0 : index
    %98 = vector.load %arg11[%c0_106, %c0_107] : memref<64x128xf32, #tpu.memory_space<vmem>>, vector<64x128xf32>
    %c0_108 = arith.constant 0 : index
    %c0_109 = arith.constant 0 : index
    %99 = vector.load %arg4[%c0_108, %c0_109] : memref<1x128xf32, #tpu.memory_space<vmem>>, vector<1x128xf32>
    %100 = vector.broadcast %99 : vector<1x128xf32> to vector<64x128xf32>
    %101 = arith.mulf %98, %100 : vector<64x128xf32>
    %c0_110 = arith.constant 0 : index
    %c0_111 = arith.constant 0 : index
    %102 = vector.load %arg5[%c0_110, %c0_111] : memref<1x128xf32, #tpu.memory_space<vmem>>, vector<1x128xf32>
    %103 = vector.broadcast %102 : vector<1x128xf32> to vector<64x128xf32>
    %104 = arith.addf %101, %103 : vector<64x128xf32>
    %105 = arith.addf %104, %97 : vector<64x128xf32>
    %cst_112 = arith.constant 0.000000e+00 : f32
    %106 = vector.broadcast %cst_112 : f32 to vector<64x128xf32>
    %107 = arith.maximumf %105, %106 : vector<64x128xf32>
    %108 = arith.truncf %107 : vector<64x128xf32> to vector<64x128xbf16>
    %c0_113 = arith.constant 0 : index
    %c0_114 = arith.constant 0 : index
    %c0_115 = arith.constant 0 : index
    %109 = vector.load %arg10[%c0_113, %c0_114, %c0_115] : memref<1x64x128xbf16, #tpu.memory_space<vmem>>, vector<1x64x128xbf16>
    %110 = vector.shape_cast %109 : vector<1x64x128xbf16> to vector<64x128xbf16>
    %111 = vector.shape_cast %108 : vector<64x128xbf16> to vector<1x64x128xbf16>
    tpu.vector_store %arg10[%c0_113, %c0_114, %c0_115], %111 {strides = array<i32>} : memref<1x64x128xbf16, #tpu.memory_space<vmem>>, vector<1x64x128xbf16>,
    return
  }
  func.func @transform_0(%arg0: i32, %arg1: i32) -> (i32, i32, i32, i32) {
    %c0_i32 = arith.constant 0 : i32
    %c0_i32_0 = arith.constant 0 : i32
    %c0_i32_1 = arith.constant 0 : i32
    %c0_i32_2 = arith.constant 0 : i32
    return %arg1, %c0_i32, %c0_i32_0, %c0_i32_1 : i32, i32, i32, i32
  }
  func.func @transform_1(%arg0: i32, %arg1: i32) -> (i32, i32, i32) {
    %c0_i32 = arith.constant 0 : i32
    %c0_i32_0 = arith.constant 0 : i32
    %c0_i32_1 = arith.constant 0 : i32
    return %c0_i32, %c0_i32_0, %arg0 : i32, i32, i32
  }
  func.func @transform_2(%arg0: i32, %arg1: i32) -> (i32, i32) {
    %c0_i32 = arith.constant 0 : i32
    %c0_i32_0 = arith.constant 0 : i32
    return %c0_i32, %arg0 : i32, i32
  }
  func.func @transform_3(%arg0: i32, %arg1: i32) -> (i32, i32) {
    %c0_i32 = arith.constant 0 : i32
    %c0_i32_0 = arith.constant 0 : i32
    return %c0_i32, %arg0 : i32, i32
  }
  func.func @transform_4(%arg0: i32, %arg1: i32) -> (i32, i32, i32) {
    %c0_i32 = arith.constant 0 : i32
    %c0_i32_0 = arith.constant 0 : i32
    %c0_i32_1 = arith.constant 0 : i32
    return %arg1, %c0_i32, %c0_i32_0 : i32, i32, i32
  }
  func.func @transform_5(%arg0: i32, %arg1: i32) -> (i32, i32) {
    %c0_i32 = arith.constant 0 : i32
    %c0_i32_0 = arith.constant 0 : i32
    return %c0_i32, %arg0 : i32, i32
  }
  func.func @transform_6(%arg0: i32, %arg1: i32) -> (i32, i32) {
    %c0_i32 = arith.constant 0 : i32
    %c0_i32_0 = arith.constant 0 : i32
    return %c0_i32, %arg0 : i32, i32
  }
  func.func @transform_7(%arg0: i32, %arg1: i32) -> (i32, i32) {
    %c0_i32 = arith.constant 0 : i32
    %c0_i32_0 = arith.constant 0 : i32
    return %c0_i32, %arg0 : i32, i32
  }
  func.func @transform_8(%arg0: i32, %arg1: i32) -> (i32, i32, i32) {
    %c0_i32 = arith.constant 0 : i32
    %c0_i32_0 = arith.constant 0 : i32
    return %arg1, %c0_i32, %arg0 : i32, i32, i32
  }
}

</mosaic_0001>

<bundles_post_ra>
// kernel: basic_block_forward.2
= control target key start
LH: loop header
LB: loop body
LE: loop exit
PB: predicated region body
PF: predicated region fallthrough
CT: control target
= control target key end

     0   :  { %s1824_s15 = smov 0   ;;  %s1826_s16 = smov 0   ;;  %s2131_s0 = inlined_call_operand.vmem [shape: f32[2,36,9,4], index: 0, kind: input, shape index: {}]   ;;  %s2132_s1 = inlined_call_operand.vmem [shape: bf16[9,4,128], index: 1, kind: input, shape index: {}]   ;;  %s2133_s2 = inlined_call_operand.vmem [shape: f32[1,128], index: 2, kind: input, shape index: {}]   ;;  %s2134_s3 = inlined_call_operand.vmem [shape: f32[1,128], index: 3, kind: input, shape index: {}]   ;;  %s2135_s4 = inlined_call_operand.vmem [shape: f32[2,64,128], index: 4, kind: output, shape index: {}]  }
   0x1   :  { %s1828_s17 = smov 0  }
   0x2 LB: > { %s23_s18 = sadd.s32 1, %s1793_s16  ;;  %p1494_p0 = scmp.ge.s32.totalorder %s1797_s17, 1  ;;  %s1797_s17 = sphi %s1828_s17, %s14_s17   ;;  %s1793_s16 = sphi %s1826_s16, %s2137_s16   ;;  %s1789_s15 = sphi %s1824_s15, %s2136_s15  }
   0x3   : > { %p24_p1 = scmp.ge.s32.totalorder %s23_s18, 2  ;;  %p201_p2 = scmp.lt.s32.totalorder %s1797_s17, 3 }
   0x5   : > { %s2139_s18 = smov (%p24_p1, %s23_s18), 0  ;;  %p202_p3 = pnand %p1494_p0, %p201_p2 }
   0x6   : > { %p240_p4 = scmp.lt.s32.totalorder (!%p202_p3), %s1789_s15, 1 }
   0x7   : > { %205 = sbr.rel (%p202_p3) target bundleno = 296 (0x128), region = 36 }
   0xc   : > { %v276_v0 = vld [vmem:[%s2132_s1] sm:$0x3]  ;;  %vm290_vm0 = vcmask 1041408   ;;  %v1510_v2 = vld [vmem:[%s2132_s1 + $0x2] sm:$0x3]  ;;  %s2141_s15 = smov (!%p240_p4, %s1789_s15), 1 }
   0xd   : > { %1741 = vmatprep.subr.msk.bf16.mxu1 %vm290_vm0, %v276_v0  ;;  %1740 = vmatprep.subr.msk.bf16.mxu0 %vm290_vm0, %v276_v0  ;;  %v292_v1 = vsel %vm290_vm0, %v276_v0, 0  ;;  %v1515_v3 = vld [vmem:[%s2132_s1 + $0x4] sm:$0x3]  ;;  %s1750_s25 = smul.u32 576, %s2141_s15  ;;  %vm277_vm1 = vcmask 31744   ;;  %v395_v18 = vsel %vm290_vm0, %v1510_v2, 0 }
   0xe   : > { %1739 = vmatpush3.bf16.msra.mxu1 %v292_v1  ;;  %1649 = vmatpush3.bf16.msra.mxu0 %v292_v1  ;;  %v513_v15 = vsel %vm290_vm0, %v1515_v3, 0  ;;  %v1528_v24 = vld [vmem:[%s2132_s1 + $0x6] sm:$0x3]  ;;  %v1541_v27 = vld [vmem:[%s2132_s1 + $0x8] sm:$0x3]  ;;  %s1602_s23 = sshll.u32 %s2141_s15, 6 }
   0xf   : > { %1742 = vmatprep.subr.msk.bf16.mxu1 %vm290_vm0, %v1510_v2  ;;  %1743 = vmatprep.subr.msk.bf16.mxu0 %vm290_vm0, %v1515_v3  ;;  %s1862_s28 = scalar_lea.vmem %s2131_s0, %s1750_s25  ;;  %v751_v36 = vsel %vm290_vm0, %v1541_v27, 0  ;;  %v632_v38 = vsel %vm290_vm0, %v1528_v24, 0  ;;  %v1554_v40 = vld [vmem:[%s2132_s1 + $0xa] sm:$0x3]  ;;  %v1567_v41 = vld [vmem:[%s2132_s1 + $0xc] sm:$0x3]  ;;  %s2099_s25 = scalar_lea.vmem %s2135_s4, %s1602_s23 }
  0x10   : > { %v264_v4 = vld [vmem:[%s1862_s28] sm:$0xff]  ;;  %v1866_v5 = vld [vmem:[%s1862_s28 + $0x10] sm:$0xff]  ;;  %v988_v0 = vsel %vm290_vm0, %v1567_v41, 0  ;;  %v869_v2 = vsel %vm290_vm0, %v1554_v40, 0 }
  0x11   : > { %v1869_v6 = vld [vmem:[%s1862_s28 + $0x40] sm:$0xff]  ;;  %v272_v7 = vpack.c.bf16 %v1866_v5, %v264_v4  ;;  %v1873_v8 = vld [vmem:[%s1862_s28 + $0x50] sm:$0xff]  ;;  %v1580_v4 = vld [vmem:[%s2132_s1 + $0xe] sm:$0x3] }
  0x12   : > { %v1876_v9 = vld [vmem:[%s1862_s28 + $0x20] sm:$0xff]  ;;  %v1879_v10 = vld [vmem:[%s1862_s28 + $0x30] sm:$0xff]  ;;  %v274_v11 = vpack.c.bf16 %v1873_v8, %v1869_v6 }
  0x13   : > { %v273_v12 = vpack.c.bf16 %v1879_v10, %v1876_v9  ;;  %v1886_v13 = vld [vmem:[%s1862_s28 + $0x60] sm:$0xff]  ;;  %v1889_v14 = vld [vmem:[%s1862_s28 + $0x70] sm:$0xff]  ;;  %1650 = vmatprep.mubr.msk.bf16.mxu0 %vm277_vm1, %v272_v7 }
  0x14   : > { %v1502_v16 = vld [vmem:[%s1862_s28 + $0x90] sm:$0xff]  ;;  %v275_v17 = vpack.c.bf16 %v1889_v14, %v1886_v13  ;;  %v1898_v19 = vld [vmem:[%s1862_s28 + $0xa0] sm:$0xff]  ;;  %1654 = vmatprep.mubr.msk.bf16.mxu1 %vm277_vm1, %v274_v11 }
  0x15   : > { %v486_v20 = vld [vmem:[%s1862_s28 + $0x1] sm:$0xff]  ;;  %v1902_v21 = vld [vmem:[%s1862_s28 + $0x11] sm:$0xff]  ;;  %1651 = vmatmul.mubr.msk.bf16.vlgmr.msra.gmra.mxu0 %vm277_vm1, %v273_v12  ;;  %v376_v22 = vpack.c.bf16 %v1898_v19, %v1502_v16 }
  0x16   : > { %v494_v23 = vpack.c.bf16 %v1902_v21, %v486_v20  ;;  %1655 = vmatmul.mubr.msk.bf16.vlgmr.msra.gmra.mxu1 %vm277_vm1, %v275_v17  ;;  %1669 = vmatpush3.bf16.msra.mxu0 %v513_v15  ;;  %v1913_v25 = vld [vmem:[%s1862_s28 + $0x21] sm:$0xff]  ;;  %v1916_v26 = vld [vmem:[%s1862_s28 + $0x31] sm:$0xff] }
  0x17   : > { %1659 = vmatpush3.bf16.msra.mxu1 %v395_v18  ;;  %1660 = vmatprep.mubr.msk.bf16.mxu1 %vm277_vm1, %v376_v22  ;;  %v1923_v28 = vld [vmem:[%s1862_s28 + $0xb0] sm:$0xff]  ;;  %v1926_v29 = vld [vmem:[%s1862_s28 + $0xc0] sm:$0xff]  ;;  %v495_v32 = vpack.c.bf16 %v1916_v26, %v1913_v25 }
  0x18   : > { %1670 = vmatprep.mubr.msk.bf16.mxu0 %vm277_vm1, %v494_v23  ;;  %1744 = vmatprep.subr.msk.bf16.mxu1 %vm290_vm0, %v1528_v24  ;;  %v1931_v30 = vld [vmem:[%s1862_s28 + $0xd0] sm:$0xff]  ;;  %v1934_v31 = vld [vmem:[%s1862_s28 + $0xe0] sm:$0xff]  ;;  %v377_v35 = vpack.c.bf16 %v1926_v29, %v1923_v28  ;;  %v969_v23 = vpack.c.bf16 %v1876_v9, %v1866_v5 }
  0x19   : > { %1745 = vmatprep.subr.msk.bf16.mxu0 %vm290_vm0, %v1541_v27  ;;  %v1940_v33 = vld [vmem:[%s1862_s28 + $0x41] sm:$0xff]  ;;  %v1943_v34 = vld [vmem:[%s1862_s28 + $0x51] sm:$0xff]  ;;  %v378_v37 = vpack.c.bf16 %v1934_v31, %v1931_v30 }
  0x1a   : > { %v496_v39 = vpack.c.bf16 %v1943_v34, %v1940_v33  ;;  %v1962_v42 = vld [vmem:[%s1862_s28 + $0xf0] sm:$0xff]  ;;  %v1965_v43 = vld [vmem:[%s1862_s28 + $0x61] sm:$0xff] }
  0x1b   : > { %v1968_v44 = vld [vmem:[%s1862_s28 + $0x71] sm:$0xff]  ;;  %v1972_v45 = vld [vmem:[%s1862_s28 + $0x100] sm:$0xff] }
  0x1c   : > { %v1533_v46 = vld [vmem:[%s1862_s28 + $0x1b0] sm:$0xff]  ;;  %v1534_v47 = vld [vmem:[%s1862_s28 + $0x1c0] sm:$0xff]  ;;  %v497_v50 = vpack.c.bf16 %v1968_v44, %v1965_v43  ;;  %v379_v51 = vpack.c.bf16 %v1972_v45, %v1962_v42 }
  0x1d   : > { %1671 = vmatmul.mubr.msk.bf16.vlgmr.msra.gmra.mxu0 %vm277_vm1, %v495_v32  ;;  %v1520_v48 = vld [vmem:[%s1862_s28 + $0x120] sm:$0xff]  ;;  %v1521_v49 = vld [vmem:[%s1862_s28 + $0x130] sm:$0xff]  ;;  %v732_v52 = vpack.c.bf16 %v1534_v47, %v1533_v46 }
  0x1e   : > { %1661 = vmatmul.mubr.msk.bf16.vlgmr.msra.gmra.mxu1 %vm277_vm1, %v377_v35  ;;  %1689 = vmatpush3.bf16.msra.mxu0 %v751_v36  ;;  %v613_v53 = vpack.c.bf16 %v1521_v49, %v1520_v48  ;;  %v1535_v54 = vld [vmem:[%s1862_s28 + $0x1d0] sm:$0xff]  ;;  %v1536_v55 = vld [vmem:[%s1862_s28 + $0x1e0] sm:$0xff]  ;;  %v1207_v48 = vpack.c.bf16 %v1940_v33, %v1916_v26 }
  0x1f   : > { %1679 = vmatpush3.bf16.msra.mxu1 %v632_v38  ;;  %1664 = vmatprep.mubr.msk.bf16.mxu1 %vm277_vm1, %v378_v37  ;;  %v1522_v56 = vld [vmem:[%s1862_s28 + $0x140] sm:$0xff]  ;;  %v1523_v57 = vld [vmem:[%s1862_s28 + $0x150] sm:$0xff]  ;;  %v733_v60 = vpack.c.bf16 %v1536_v55, %v1535_v54  ;;  %v970_v37 = vpack.c.bf16 %v1869_v6, %v1879_v10 }
  0x20   : > { %1674 = vmatprep.mubr.msk.bf16.mxu0 %vm277_vm1, %v496_v39  ;;  %1746 = vmatprep.subr.msk.bf16.mxu1 %vm290_vm0, %v1554_v40  ;;  %v1524_v58 = vld [vmem:[%s1862_s28 + $0x160] sm:$0xff]  ;;  %v1525_v59 = vld [vmem:[%s1862_s28 + $0x170] sm:$0xff]  ;;  %v614_v63 = vpack.c.bf16 %v1523_v57, %v1522_v56  ;;  %v1107_v39 = vsel %vm290_vm0, %v1580_v4, 0  ;;  %v971_v40 = vpack.c.bf16 %v1886_v13, %v1873_v8  ;;  %v1206_v8 = vpack.c.bf16 %v1913_v25, %v1902_v21 }
  0x21   : > { %1747 = vmatprep.subr.msk.bf16.mxu0 %vm290_vm0, %v1567_v41  ;;  %v1537_v61 = vld [vmem:[%s1862_s28 + $0x1f0] sm:$0xff]  ;;  %v1538_v62 = vld [vmem:[%s1862_s28 + $0x200] sm:$0xff]  ;;  %v615_v1 = vpack.c.bf16 %v1525_v59, %v1524_v58  ;;  %v1088_v13 = vpack.c.bf16 %v1923_v28, %v1898_v19  ;;  %v1208_v21 = vpack.c.bf16 %v1965_v43, %v1943_v34  ;;  %v1090_v19 = vpack.c.bf16 %v1962_v42, %v1934_v31 }
  0x22   : > { %v734_v3 = vpack.c.bf16 %v1538_v62, %v1537_v61  ;;  %v1539_v7 = vld [vmem:[%s1862_s28 + $0x210] sm:$0xff]  ;;  %v1540_v11 = vld [vmem:[%s1862_s28 + $0x220] sm:$0xff] }
  0x23   : > { %v1593_v12 = vld [vmem:[%s2132_s1 + $0x10] sm:$0x3]  ;;  %v1526_v15 = vld [vmem:[%s1862_s28 + $0x180] sm:$0xff]  ;;  %v735_v20 = vpack.c.bf16 %v1540_v11, %v1539_v7 }
  0x24   : > { %v1527_v16 = vld [vmem:[%s1862_s28 + $0x190] sm:$0xff]  ;;  %v1546_v17 = vld [vmem:[%s1862_s28 + $0x121] sm:$0xff]  ;;  %v1225_v9 = vsel %vm290_vm0, %v1593_v12, 0 }
  0x25   : > { %1675 = vmatmul.mubr.msk.bf16.gmra.mxu0 %vm277_vm1, %v497_v50  ;;  %v1547_v18 = vld [vmem:[%s1862_s28 + $0x131] sm:$0xff]  ;;  %v616_v22 = vpack.c.bf16 %v1527_v16, %v1526_v15  ;;  %v1548_v27 = vld [vmem:[%s1862_s28 + $0x141] sm:$0xff] }
  0x26   : > { %1665 = vmatmul.mubr.msk.bf16.gmra.mxu1 %vm277_vm1, %v379_v51  ;;  %1690 = vmatprep.mubr.msk.bf16.mxu0 %vm277_vm1, %v732_v52  ;;  %v850_v24 = vpack.c.bf16 %v1547_v18, %v1546_v17  ;;  %v1549_v32 = vld [vmem:[%s1862_s28 + $0x151] sm:$0xff]  ;;  %v1550_v35 = vld [vmem:[%s1862_s28 + $0x161] sm:$0xff] }
  0x27   : > { %1680 = vmatprep.mubr.msk.bf16.mxu1 %vm277_vm1, %v613_v53  ;;  %v1551_v36 = vld [vmem:[%s1862_s28 + $0x171] sm:$0xff]  ;;  %v851_v5 = vpack.c.bf16 %v1549_v32, %v1548_v27  ;;  %v1566_v41 = vld [vmem:[%s1862_s28 + $0x80] sm:$0xff] }
  0x28   : > { %v852_v38 = vpack.c.bf16 %v1551_v36, %v1550_v35  ;;  %v1552_v46 = vld [vmem:[%s1862_s28 + $0x181] sm:$0xff]  ;;  %v1553_v6 = vld [vmem:[%s1862_s28 + $0x191] sm:$0xff]  ;;  %v972_v10 = vpack.c.bf16 %v1566_v41, %v1889_v14  ;;  %v1089_v14 = vpack.c.bf16 %v1931_v30, %v1926_v29 }
  0x29   : > { %v853_v47 = vpack.c.bf16 %v1553_v6, %v1552_v46  ;;  %v1592_v25 = vld [vmem:[%s1862_s28 + $0x81] sm:$0xff]  ;;  %v1579_v28 = vld [vmem:[%s1862_s28 + $0x110] sm:$0xff] }
  0x2a   : > { %v1209_v26 = vpack.c.bf16 %v1592_v25, %v1968_v44  ;;  %v1091_v29 = vpack.c.bf16 %v1579_v28, %v1972_v45 }
  0x2d   : > { %1691 = vmatmul.mubr.msk.bf16.vlgmr.msra.gmra.mxu0 %vm277_vm1, %v733_v60 }
  0x2e   : > { %1681 = vmatmul.mubr.msk.bf16.vlgmr.msra.gmra.mxu1 %vm277_vm1, %v614_v63  ;;  %1709 = vmatpush3.bf16.msra.mxu0 %v988_v0 }
  0x2f   : > { %1699 = vmatpush3.bf16.msra.mxu1 %v869_v2  ;;  %1684 = vmatprep.mubr.msk.bf16.mxu1 %vm277_vm1, %v615_v1 }
  0x30   : > { %1694 = vmatprep.mubr.msk.bf16.mxu0 %vm277_vm1, %v734_v3  ;;  %1748 = vmatprep.subr.msk.bf16.mxu1 %vm290_vm0, %v1580_v4 }
  0x31   : > { %1749 = vmatprep.subr.msk.bf16.mxu0 %vm290_vm0, %v1593_v12 }
  0x35   : > { %1695 = vmatmul.mubr.msk.bf16.gmra.mxu0 %vm277_vm1, %v735_v20 }
  0x36   : > { %1685 = vmatmul.mubr.msk.bf16.gmra.mxu1 %vm277_vm1, %v616_v22  ;;  %1710 = vmatprep.mubr.msk.bf16.mxu0 %vm277_vm1, %v969_v23 }
  0x37   : > { %1700 = vmatprep.mubr.msk.bf16.mxu1 %vm277_vm1, %v850_v24 }
  0x3d   : > { %1711 = vmatmul.mubr.msk.bf16.vlgmr.msra.gmra.mxu0 %vm277_vm1, %v970_v37 }
  0x3e   : > { %1701 = vmatmul.mubr.msk.bf16.vlgmr.msra.gmra.mxu1 %vm277_vm1, %v851_v5  ;;  %1729 = vmatpush3.bf16.msra.mxu0 %v1225_v9 }
  0x3f   : > { %1719 = vmatpush3.bf16.msra.mxu1 %v1107_v39  ;;  %1704 = vmatprep.mubr.msk.bf16.mxu1 %vm277_vm1, %v852_v38 }
  0x40   : > { %1714 = vmatprep.mubr.msk.bf16.mxu0 %vm277_vm1, %v971_v40 }
  0x45   : > { %1715 = vmatmul.mubr.msk.bf16.gmra.mxu0 %vm277_vm1, %v972_v10 }
  0x46   : > { %1705 = vmatmul.mubr.msk.bf16.gmra.mxu1 %vm277_vm1, %v853_v47  ;;  %1730 = vmatprep.mubr.msk.bf16.mxu0 %vm277_vm1, %v1206_v8 }
  0x47   : > { %1720 = vmatprep.mubr.msk.bf16.mxu1 %vm277_vm1, %v1088_v13 }
  0x4d   : > { %1731 = vmatmul.mubr.msk.bf16.vlgmr.msra.gmra.mxu0 %vm277_vm1, %v1207_v48 }
  0x4e   : > { %1721 = vmatmul.mubr.msk.bf16.vlgmr.msra.gmra.mxu1 %vm277_vm1, %v1089_v14  ;;  %1734 = vmatprep.mubr.msk.bf16.mxu0 %vm277_vm1, %v1208_v21 }
  0x4f   : > { %1724 = vmatprep.mubr.msk.bf16.mxu1 %vm277_vm1, %v1090_v19 }
  0x55   : > { %1735 = vmatmul.mubr.msk.bf16.gmra.mxu0 %vm277_vm1, %v1209_v26 }
  0x56   : > { %1725 = vmatmul.mubr.msk.bf16.gmra.mxu1 %vm277_vm1, %v1091_v29 }
  0xd5   : > { %v1652_v30 = vpop.f32.mrf.mxu0 }
  0xd6   : > { %v1656_v31 = vpop.f32.mrf.mxu1 }
  0xd7   : > { %v328_v33 = vpop.f32.mrf.mxu0 }
  0xd8   : > { %v344_v34 = vpop.f32.mrf.mxu1 }
  0xd9   : > { %v1653_v42 = vpop.f32.mrf.mxu0 }
  0xda   : > { %v1657_v43 = vpop.f32.mrf.mxu1 }
  0xdb   : > { %v331_v49 = vpop.f32.mrf.mxu0 }
  0xdc   : > { %v2067_v50 = vpop.f32.mrf.mxu1 }
  0xdd   : > { %v1672_v51 = vpop.f32.mrf.mxu0 }
  0xde   : > { %v1662_v52 = vpop.f32.mrf.mxu1 }
  0xdf   : > { %v549_v53 = vpop.f32.mrf.mxu0  ;;  %v472_v32 = vadd.f32 %v1662_v52, %v1652_v30 }
  0xe0   : > { %v431_v54 = vpop.f32.mrf.mxu1 }
  0xe1   : > { %v1673_v44 = vpop.f32.mrf.mxu0  ;;  %v470_v37 = vadd.f32 %v431_v54, %v328_v33  ;;  %v590_v38 = vadd.f32 %v1672_v51, %v472_v32 }
  0xe2   : > { %v1663_v55 = vpop.f32.mrf.mxu1 }
  0xe3   : > { %v552_v45 = vpop.f32.mrf.mxu0  ;;  %v473_v39 = vadd.f32 %v1663_v55, %v1653_v42  ;;  %v588_v46 = vadd.f32 %v549_v53, %v470_v37 }
  0xe4   : > { %v434_v56 = vpop.f32.mrf.mxu1 }
  0xe5   : > { %v1676_v57 = vpop.f32.mrf.mxu0  ;;  %v471_v6 = vadd.f32 %v434_v56, %v331_v49  ;;  %v591_v13 = vadd.f32 %v1673_v44, %v473_v39 }
  0xe6   : > { %v1666_v58 = vpop.f32.mrf.mxu1 }
  0xe7   : > { %v565_v59 = vpop.f32.mrf.mxu0  ;;  %v476_v21 = vadd.f32 %v1666_v58, %v1656_v31  ;;  %v589_v28 = vadd.f32 %v552_v45, %v471_v6 }
  0xe8   : > { %v447_v60 = vpop.f32.mrf.mxu1 }
  0xe9   : > { %v1677_v61 = vpop.f32.mrf.mxu0  ;;  %v474_v19 = vadd.f32 %v447_v60, %v344_v34  ;;  %v594_v54 = vadd.f32 %v1676_v57, %v476_v21 }
  0xea   : > { %v1667_v62 = vpop.f32.mrf.mxu1 }
  0xeb   : > { %v2069_v63 = vpop.f32.mrf.mxu0  ;;  %v477_v33 = vadd.f32 %v1667_v62, %v1657_v43  ;;  %v592_v55 = vadd.f32 %v565_v59, %v474_v19 }
  0xec   : > { %v450_v0 = vpop.f32.mrf.mxu1 }
  0xed   : > { %v1692_v1 = vpop.f32.mrf.mxu0  ;;  %v475_v44 = vadd.f32 %v450_v0, %v2067_v50  ;;  %v595_v34 = vadd.f32 %v1677_v61, %v477_v33  ;;  %v2082_v61 = vld [vmem:[%s2133_s2] ss:$0 sm:$0xff] }
  0xee   : > { %v1682_v2 = vpop.f32.mrf.mxu1 }
  0xef   : > { %v787_v3 = vpop.f32.mrf.mxu0  ;;  %v709_v10 = vadd.f32 %v1682_v2, %v590_v38 }
  0xf0   : > { %v668_v4 = vpop.f32.mrf.mxu1 }
  0xf1   : > { %v1693_v7 = vpop.f32.mrf.mxu0  ;;  %v707_v48 = vadd.f32 %v668_v4, %v588_v46  ;;  %v828_v26 = vadd.f32 %v1692_v1, %v709_v10 }
  0xf2   : > { %v1683_v11 = vpop.f32.mrf.mxu1 }
  0xf3   : > { %v790_v12 = vpop.f32.mrf.mxu0  ;;  %v710_v29 = vadd.f32 %v1683_v11, %v591_v13  ;;  %v826_v51 = vadd.f32 %v787_v3, %v707_v48  ;;  %v593_v3 = vadd.f32 %v2069_v63, %v475_v44 }
  0xf4   : > { %v671_v15 = vpop.f32.mrf.mxu1 }
  0xf5   : > { %v1696_v16 = vpop.f32.mrf.mxu0  ;;  %v708_v52 = vadd.f32 %v671_v15, %v589_v28  ;;  %v829_v2 = vadd.f32 %v1693_v7, %v710_v29 }
  0xf6   : > { %v1686_v17 = vpop.f32.mrf.mxu1 }
  0xf7   : > { %v803_v18 = vpop.f32.mrf.mxu0  ;;  %v713_v58 = vadd.f32 %v1686_v17, %v594_v54  ;;  %v827_v1 = vadd.f32 %v790_v12, %v708_v52 }
  0xf8   : > { %v684_v20 = vpop.f32.mrf.mxu1 }
  0xf9   : > { %v2071_v22 = vpop.f32.mrf.mxu0  ;;  %v711_v45 = vadd.f32 %v684_v20, %v592_v55  ;;  %v832_v0 = vadd.f32 %v1696_v16, %v713_v58  ;;  %v2088_v16 = vld [vmem:[%s2134_s3] ss:$0 sm:$0xff] }
  0xfa   : > { %v1687_v23 = vpop.f32.mrf.mxu1 }
  0xfb   : > { %v2073_v24 = vpop.f32.mrf.mxu0  ;;  %v714_v15 = vadd.f32 %v1687_v23, %v595_v34  ;;  %v830_v7 = vadd.f32 %v803_v18, %v711_v45 }
  0xfc   : > { %v687_v27 = vpop.f32.mrf.mxu1 }
  0xfd   : > { %v1712_v35 = vpop.f32.mrf.mxu0  ;;  %v712_v37 = vadd.f32 %v687_v27, %v593_v3  ;;  %v833_v23 = vadd.f32 %v2071_v22, %v714_v15 }
  0xfe   : > { %v1702_v36 = vpop.f32.mrf.mxu1 }
  0xff   : > { %v1024_v5 = vpop.f32.mrf.mxu0  ;;  %v946_v53 = vadd.f32 %v1702_v36, %v828_v26  ;;  %v831_v46 = vadd.f32 %v2073_v24, %v712_v37 }
 0x100   : > { %v905_v9 = vpop.f32.mrf.mxu1 }
 0x101   : > { %v1713_v40 = vpop.f32.mrf.mxu0  ;;  %v944_v4 = vadd.f32 %v905_v9, %v826_v51  ;;  %v1065_v11 = vadd.f32 %v1712_v35, %v946_v53 }
 0x102   : > { %v1703_v41 = vpop.f32.mrf.mxu1 }
 0x103   : > { %v1027_v47 = vpop.f32.mrf.mxu0  ;;  %v947_v43 = vadd.f32 %v1703_v41, %v829_v2  ;;  %v1063_v57 = vadd.f32 %v1024_v5, %v944_v4 }
 0x104   : > { %v908_v8 = vpop.f32.mrf.mxu1 }
 0x105   : > { %v2075_v14 = vpop.f32.mrf.mxu0  ;;  %v945_v59 = vadd.f32 %v908_v8, %v827_v1  ;;  %v1066_v17 = vadd.f32 %v1713_v40, %v947_v43 }
 0x106   : > { %v1706_v25 = vpop.f32.mrf.mxu1 }
 0x107   : > { %v1040_v30 = vpop.f32.mrf.mxu0  ;;  %v950_v5 = vadd.f32 %v1706_v25, %v832_v0  ;;  %v1064_v27 = vadd.f32 %v1027_v47, %v945_v59 }
 0x108   : > { %v921_v42 = vpop.f32.mrf.mxu1 }
 0x109   : > { %v1717_v49 = vpop.f32.mrf.mxu0  ;;  %v948_v9 = vadd.f32 %v921_v42, %v830_v7  ;;  %v1069_v19 = vadd.f32 %v2075_v14, %v950_v5 }
 0x10a   : > { %v1707_v56 = vpop.f32.mrf.mxu1 }
 0x10b   : > { %v1043_v31 = vpop.f32.mrf.mxu0  ;;  %v951_v6 = vadd.f32 %v1707_v56, %v833_v23  ;;  %v1067_v47 = vadd.f32 %v1040_v30, %v948_v9 }
 0x10c   : > { %v924_v60 = vpop.f32.mrf.mxu1 }
 0x10d   : > { %v1732_v62 = vpop.f32.mrf.mxu0  ;;  %v949_v25 = vadd.f32 %v924_v60, %v831_v46  ;;  %v1070_v51 = vadd.f32 %v1717_v49, %v951_v6 }
 0x10e   : > { %v1722_v32 = vpop.f32.mrf.mxu1 }
 0x10f   : > { %v1184_v36 = vadd.f32 %v1722_v32, %v1065_v11  ;;  %v1261_v50 = vpop.f32.mrf.mxu0  ;;  %v1068_v44 = vadd.f32 %v1043_v31, %v949_v25 }
 0x110   : > { %v1143_v12 = vpop.f32.mrf.mxu1 }
 0x111   : > { %v1302_v20 = vadd.f32 %v1732_v62, %v1184_v36  ;;  %v1182_v35 = vadd.f32 %v1143_v12, %v1063_v57  ;;  %v1733_v63 = vpop.f32.mrf.mxu0 }
 0x112   : > { %v1723_v18 = vpop.f32.mrf.mxu1 }
 0x113   : > { %v1333_v38 = vmul.f32 %v2082_v61, %v1302_v20  ;;  %v1300_v39 = vadd.f32 %v1261_v50, %v1182_v35  ;;  %v1185_v41 = vadd.f32 %v1723_v18, %v1066_v17  ;;  %v1264_v40 = vpop.f32.mrf.mxu0 }
 0x114   : > { %v1146_v10 = vpop.f32.mrf.mxu1 }
 0x115   : > { %v1348_v22 = vadd.f32 %v2088_v16, %v1333_v38  ;;  %v1331_v8 = vmul.f32 %v2082_v61, %v1300_v39  ;;  %v1303_v13 = vadd.f32 %v1733_v63, %v1185_v41  ;;  %v1183_v48 = vadd.f32 %v1146_v10, %v1064_v27  ;;  %v1736_v21 = vpop.f32.mrf.mxu0 }
 0x116   : > { %v1726_v24 = vpop.f32.mrf.mxu1 }
 0x117   : > { %v1356_v28 = vmax.f32 %v1348_v22, 0.0  ;;  %v1346_v26 = vadd.f32 %v2088_v16, %v1331_v8  ;;  %v1334_v29 = vmul.f32 %v2082_v61, %v1303_v13  ;;  %v1301_v33 = vadd.f32 %v1264_v40, %v1183_v48  ;;  %v1277_v42 = vpop.f32.mrf.mxu0 }
 0x118   : > { %v1188_v52 = vadd.f32 %v1726_v24, %v1069_v19  ;;  %v1159_v14 = vpop.f32.mrf.mxu1 }
 0x119   : > { %1364 = vst [vmem:[%s2099_s25 + $0x10] sm:$0xff] %v1356_v28  ;;  %v1354_v30 = vmax.f32 %v1346_v26, 0.0  ;;  %v1349_v53 = vadd.f32 %v2088_v16, %v1334_v29  ;;  %v1332_v54 = vmul.f32 %v2082_v61, %v1301_v33  ;;  %v1186_v55 = vadd.f32 %v1159_v14, %v1067_v47  ;;  %v1737_v4 = vpop.f32.mrf.mxu0 }
 0x11a   : > { %v1306_v56 = vadd.f32 %v1736_v21, %v1188_v52  ;;  %v1727_v2 = vpop.f32.mrf.mxu1 }
 0x11b   : > { %1362 = vst [vmem:[%s2099_s25] sm:$0xff] %v1354_v30  ;;  %v1357_v34 = vmax.f32 %v1349_v53, 0.0  ;;  %v1347_v58 = vadd.f32 %v2088_v16, %v1332_v54  ;;  %v1304_v49 = vadd.f32 %v1277_v42, %v1186_v55  ;;  %v1189_v45 = vadd.f32 %v1727_v2, %v1070_v51  ;;  %v1280_v15 = vpop.f32.mrf.mxu0 }
 0x11c   : > { %v1337_v60 = vmul.f32 %v2082_v61, %v1306_v56  ;;  %v1162_v1 = vpop.f32.mrf.mxu1 }
 0x11d   : > { %1365 = vst [vmem:[%s2099_s25 + $0x18] sm:$0xff] %v1357_v34  ;;  %v1355_v11 = vmax.f32 %v1347_v58, 0.0  ;;  %v1335_v43 = vmul.f32 %v2082_v61, %v1304_v49  ;;  %v1307_v31 = vadd.f32 %v1737_v4, %v1189_v45  ;;  %v1187_v62 = vadd.f32 %v1162_v1, %v1068_v44 }
 0x11e   : > { %v1352_v3 = vadd.f32 %v2088_v16, %v1337_v60 }
 0x11f   : > { %1363 = vst [vmem:[%s2099_s25 + $0x8] sm:$0xff] %v1355_v11  ;;  %v1350_v32 = vadd.f32 %v2088_v16, %v1335_v43  ;;  %v1338_v57 = vmul.f32 %v2082_v61, %v1307_v31  ;;  %v1305_v59 = vadd.f32 %v1280_v15, %v1187_v62 }
 0x120   : > { %v1360_v36 = vmax.f32 %v1352_v3, 0.0 }
 0x121   : > { %v1358_v50 = vmax.f32 %v1350_v32, 0.0  ;;  %v1353_v0 = vadd.f32 %v2088_v16, %v1338_v57  ;;  %v1336_v7 = vmul.f32 %v2082_v61, %v1305_v59 }
 0x122   : > { %1368 = vst [vmem:[%s2099_s25 + $0x30] sm:$0xff] %v1360_v36 }
 0x123   : > { %1366 = vst [vmem:[%s2099_s25 + $0x20] sm:$0xff] %v1358_v50  ;;  %v1361_v37 = vmax.f32 %v1353_v0, 0.0  ;;  %v1351_v12 = vadd.f32 %v2088_v16, %v1336_v7 }
 0x125   : > { %1369 = vst [vmem:[%s2099_s25 + $0x38] sm:$0xff] %v1361_v37  ;;  %v1359_v17 = vmax.f32 %v1351_v12, 0.0 }
 0x127   : > { %1367 = vst [vmem:[%s2099_s25 + $0x28] sm:$0xff] %v1359_v17 }
 0x128 PF: > { %s14_s17 = sadd.s32 1, %s1797_s17   ;;  %s2136_s15 = smov %s1793_s16 }
 0x129   : > { %p11_p5 = scmp.ge.s32.totalorder %s14_s17, 4   ;;  %s2137_s16 = smov %s2139_s18 }
 0x12b   :  { %13 = sbr.rel (!%p11_p5) target bundleno = 2 (0x2), region = 88 }

// kernel: basic_block_forward.3
= control target key start
LH: loop header
LB: loop body
LE: loop exit
PB: predicated region body
PF: predicated region fallthrough
CT: control target
= control target key end

     0   :  { %s3148_s27 = smov 0   ;;  %s3150_s28 = smov 0   ;;  %s3710_s0 = inlined_call_operand.vmem [shape: f32[2,10,10,128], index: 0, kind: input, shape index: {}]   ;;  %s3711_s1 = inlined_call_operand.vmem [shape: bf16[9,128,128], index: 1, kind: input, shape index: {}]   ;;  %s3712_s2 = inlined_call_operand.vmem [shape: f32[1,128], index: 2, kind: input, shape index: {}]   ;;  %s3713_s3 = inlined_call_operand.vmem [shape: f32[1,128], index: 3, kind: input, shape index: {}]   ;;  %s3714_s4 = inlined_call_operand.vmem [shape: bf16[2,64,4], index: 4, kind: input, shape index: {}]   ;;  %s3715_s5 = inlined_call_operand.vmem [shape: bf16[4,128], index: 5, kind: input, shape index: {}]   ;;  %s3716_s6 = inlined_call_operand.vmem [shape: f32[1,128], index: 6, kind: input, shape index: {}]   ;;  %s3717_s7 = inlined_call_operand.vmem [shape: f32[1,128], index: 7, kind: input, shape index: {}]   ;;  %s3718_s8 = inlined_call_operand.vmem [shape: bf16[2,64,128], index: 8, kind: output, shape index: {}]  }
   0x1   :  { %s3152_s29 = smov 0  }
   0x2 LB: > { %s27_s30 = sadd.s32 1, %s3097_s28  ;;  %p2329_p0 = scmp.ge.s32.totalorder %s3101_s29, 1  ;;  %s3101_s29 = sphi %s3152_s29, %s18_s29   ;;  %s3097_s28 = sphi %s3150_s28, %s3740_s28   ;;  %s3093_s27 = sphi %s3148_s27, %s3739_s27  }
   0x3   : > { %p28_p1 = scmp.ge.s32.totalorder %s27_s30, 2  ;;  %p336_p2 = scmp.lt.s32.totalorder %s3101_s29, 3 }
   0x5   : > { %s3742_s30 = smov (%p28_p1, %s27_s30), 0  ;;  %p337_p3 = pnand %p2329_p0, %p336_p2 }
   0x7   : > { %340 = sbr.rel (%p337_p3) target bundleno = 394 (0x18a), region = 52 }
   0xc   : > { %v3003_v0 = vld [vmem:[%s3711_s1 + $0x38] sm:$0xff]   ;;  %p398_p4 = scmp.lt.s32.totalorder %s3093_s27, 1  ;;  %v3005_v2 = vld [vmem:[%s3711_s1 + $0x30] sm:$0xff]   ;;  %v3007_v4 = vld [vmem:[%s3711_s1 + $0x28] sm:$0xff]   ;;  %vm1958_vm0 = vcmask 1041408   ;;  %vm1945_vm1 = vcmask 31744  }
   0xd   : > { %v3004_v1 = vld [vmem:[%s3711_s1 + $0x78] sm:$0xff]   ;;  %2751 = vmatprep.subr.bf16.mxu0 %v3003_v0  ;;  %v3006_v3 = vld [vmem:[%s3711_s1 + $0x70] sm:$0xff]   ;;  %v3008_v5 = vld [vmem:[%s3711_s1 + $0x68] sm:$0xff]  }
   0xe   : > { %2775 = vmatprep.subr.bf16.mxu1 %v3004_v1  ;;  %2752 = vmatpush3.bf16.msra.mxu0 %v3003_v0  ;;  %s3744_s27 = smov (!%p398_p4, %s3093_s27), 1  ;;  %v3009_v6 = vld [vmem:[%s3711_s1 + $0x20] sm:$0xff]   ;;  %v3011_v8 = vld [vmem:[%s3711_s1 + $0x18] sm:$0xff]   ;;  %v3013_v10 = vld [vmem:[%s3711_s1 + $0x10] sm:$0xff]  }
   0xf   : > { %2776 = vmatpush3.bf16.msra.mxu1 %v3004_v1  ;;  %2753 = vmatprep.subr.bf16.mxu0 %v3005_v2  ;;  %v3010_v7 = vld [vmem:[%s3711_s1 + $0x60] sm:$0xff]   ;;  %s2978_s25 = smul.u32 160, %s3744_s27  ;;  %v3012_v9 = vld [vmem:[%s3711_s1 + $0x58] sm:$0xff]   ;;  %v3014_v14 = vld [vmem:[%s3711_s1 + $0x50] sm:$0xff]   ;;  %s2605_s10 = sshll.u32 %s3744_s27, 5 }
  0x10   : > { %2777 = vmatprep.subr.bf16.mxu1 %v3006_v3  ;;  %v3015_v18 = vld [vmem:[%s3711_s1 + $0x8] sm:$0xff]   ;;  %v3017_v20 = vld [vmem:[%s3711_s1] sm:$0xff]   ;;  %v3019_v26 = vld [vmem:[%s3711_s1 + $0xb8] sm:$0xff]   ;;  %s3430_s16 = scalar_lea.vmem %s3714_s4, %s2605_s10 }
  0x11   : > { %s3202_s14 = scalar_lea.vmem %s3710_s0, %s2978_s25  ;;  %v3016_v19 = vld [vmem:[%s3711_s1 + $0x48] sm:$0xff]   ;;  %v3018_v21 = vld [vmem:[%s3711_s1 + $0x40] sm:$0xff]   ;;  %v3020_v27 = vld [vmem:[%s3711_s1 + $0xf8] sm:$0xff]   ;;  %s3684_s25 = scalar_lea.vmem %s3718_s8, %s2605_s10 }
  0x12   : > { %2754 = vmatpush3.bf16.msra.mxu0 %v3005_v2  ;;  %v437_v11 = vld [vmem:[%s3202_s14] sm:$0xff]  ;;  %v3209_v12 = vld [vmem:[%s3202_s14 + $0x10] sm:$0xff]  ;;  %v3023_v38 = vld [vmem:[%s3711_s1 + $0xa8] sm:$0xff]  }
  0x13   : > { %2778 = vmatpush3.bf16.msra.mxu1 %v3006_v3  ;;  %2755 = vmatprep.subr.bf16.mxu0 %v3007_v4  ;;  %v586_v13 = vld [vmem:[%s3202_s14 + $0x1] sm:$0xff]  ;;  %v445_v15 = vpack.c.bf16 %v3209_v12, %v437_v11  ;;  %v3217_v16 = vld [vmem:[%s3202_s14 + $0x11] sm:$0xff] }
  0x14   : > { %2779 = vmatprep.subr.bf16.mxu1 %v3008_v5  ;;  %v594_v17 = vpack.c.bf16 %v3217_v16, %v586_v13  ;;  %v439_v22 = vld [vmem:[%s3202_s14 + $0x20] sm:$0xff]  ;;  %v3234_v23 = vld [vmem:[%s3202_s14 + $0x30] sm:$0xff]  ;;  %v3024_v43 = vld [vmem:[%s3711_s1 + $0xe8] sm:$0xff]  }
  0x15   : > { %2767 = vmatprep.mubr.bf16.mxu0 %v445_v15  ;;  %v3237_v24 = vld [vmem:[%s3202_s14 + $0x21] sm:$0xff]  ;;  %v3240_v25 = vld [vmem:[%s3202_s14 + $0x31] sm:$0xff]  ;;  %v3249_v28 = vpack.c.bf16 %v3234_v23, %v439_v22  ;;  %v927_v51 = vpack.c.bf16 %v439_v22, %v3209_v12 }
  0x16   : > { %2756 = vmatpush3.bf16.msra.mxu0 %v3007_v4  ;;  %2791 = vmatprep.mubr.bf16.mxu1 %v594_v17  ;;  %v3021_v29 = vld [vmem:[%s3711_s1 + $0xb0] sm:$0xff]   ;;  %v3255_v30 = vld [vmem:[%s3202_s14 + $0x40] sm:$0xff]  ;;  %v3265_v33 = vpack.c.bf16 %v3240_v25, %v3237_v24  ;;  %v3027_v52 = vld [vmem:[%s3711_s1 + $0x98] sm:$0xff]  }
  0x17   : > { %2780 = vmatpush3.bf16.msra.mxu1 %v3008_v5  ;;  %2757 = vmatprep.subr.bf16.mxu0 %v3009_v6  ;;  %v3258_v31 = vld [vmem:[%s3202_s14 + $0x50] sm:$0xff]  ;;  %v3261_v32 = vld [vmem:[%s3202_s14 + $0x41] sm:$0xff]  ;;  %v3028_v53 = vld [vmem:[%s3711_s1 + $0xd8] sm:$0xff]   ;;  %v928_v3 = vpack.c.bf16 %v3255_v30, %v3234_v23 }
  0x18   : > { %2781 = vmatprep.subr.bf16.mxu1 %v3010_v7  ;;  %v3268_v34 = vld [vmem:[%s3202_s14 + $0x51] sm:$0xff]  ;;  %v3275_v36 = vpack.c.bf16 %v3258_v31, %v3255_v30  ;;  %v3278_v37 = vld [vmem:[%s3202_s14 + $0x60] sm:$0xff]  ;;  %v3031_v56 = vld [vmem:[%s3711_s1 + $0x88] sm:$0xff]  }
  0x19   : > { %v3022_v35 = vld [vmem:[%s3711_s1 + $0xf0] sm:$0xff]   ;;  %v3286_v39 = vpack.c.bf16 %v3268_v34, %v3261_v32  ;;  %v3293_v41 = vld [vmem:[%s3202_s14 + $0x61] sm:$0xff]  ;;  %v3035_v62 = vld [vmem:[%s3711_s1 + $0x138] sm:$0xff]  }
  0x1a   : > { %2758 = vmatpush3.bf16.msra.mxu0 %v3009_v6  ;;  %v3289_v40 = vld [vmem:[%s3202_s14 + $0x70] sm:$0xff]  ;;  %v752_v45 = vld [vmem:[%s3202_s14 + $0x2] sm:$0xff]  ;;  %v3036_v63 = vld [vmem:[%s3711_s1 + $0x178] sm:$0xff]  }
  0x1b   : > { %2782 = vmatpush3.bf16.msra.mxu1 %v3010_v7  ;;  %2759 = vmatprep.subr.bf16.mxu0 %v3011_v8  ;;  %v3296_v42 = vld [vmem:[%s3202_s14 + $0x71] sm:$0xff]  ;;  %v3305_v44 = vpack.c.bf16 %v3289_v40, %v3278_v37  ;;  %v3025_v48 = vld [vmem:[%s3711_s1 + $0xa0] sm:$0xff]   ;;  %v3032_v57 = vld [vmem:[%s3711_s1 + $0xc8] sm:$0xff]  }
  0x1c   : > { %2783 = vmatprep.subr.bf16.mxu1 %v3012_v9  ;;  %v3309_v46 = vld [vmem:[%s3202_s14 + $0x12] sm:$0xff]  ;;  %v3313_v47 = vpack.c.bf16 %v3296_v42, %v3293_v41  ;;  %v3026_v49 = vld [vmem:[%s3711_s1 + $0xe0] sm:$0xff]   ;;  %v3040_v12 = vld [vmem:[%s3711_s1 + $0x168] sm:$0xff]  }
  0x1d   : > { %v760_v50 = vpack.c.bf16 %v3309_v46, %v752_v45  ;;  %v3029_v54 = vld [vmem:[%s3711_s1 + $0x90] sm:$0xff]   ;;  %v3033_v58 = vld [vmem:[%s3711_s1 + $0x80] sm:$0xff]   ;;  %v3047_v23 = vld [vmem:[%s3711_s1 + $0x108] sm:$0xff]  }
  0x1e   : > { %2760 = vmatpush3.bf16.msra.mxu0 %v3011_v8  ;;  %v3030_v55 = vld [vmem:[%s3711_s1 + $0xd0] sm:$0xff]   ;;  %v3034_v59 = vld [vmem:[%s3711_s1 + $0xc0] sm:$0xff]   ;;  %v3052_v30 = vld [vmem:[%s3711_s1 + $0x1f8] sm:$0xff]  }
  0x1f   : > { %2784 = vmatpush3.bf16.msra.mxu1 %v3012_v9  ;;  %2761 = vmatprep.subr.bf16.mxu0 %v3013_v10  ;;  %v754_v60 = vld [vmem:[%s3202_s14 + $0x22] sm:$0xff]  ;;  %v3351_v61 = vld [vmem:[%s3202_s14 + $0x32] sm:$0xff]  ;;  %v929_v9 = vpack.c.bf16 %v3278_v37, %v3258_v31  ;;  %v1094_v31 = vpack.c.bf16 %v3261_v32, %v3240_v25 }
  0x20   : > { %2785 = vmatprep.subr.bf16.mxu1 %v3014_v14  ;;  %v3360_v0 = vld [vmem:[%s3202_s14 + $0x42] sm:$0xff]  ;;  %v3363_v1 = vpack.c.bf16 %v3351_v61, %v754_v60  ;;  %v3366_v2 = vld [vmem:[%s3202_s14 + $0x52] sm:$0xff] }
  0x21   : > { %v3037_v4 = vld [vmem:[%s3711_s1 + $0x130] sm:$0xff]   ;;  %v3378_v6 = vpack.c.bf16 %v3366_v2, %v3360_v0  ;;  %v3381_v7 = vld [vmem:[%s3202_s14 + $0x62] sm:$0xff] }
  0x22   : > { %2762 = vmatpush3.bf16.msra.mxu0 %v3013_v10  ;;  %v3038_v5 = vld [vmem:[%s3711_s1 + $0x170] sm:$0xff]   ;;  %v3039_v10 = vld [vmem:[%s3711_s1 + $0x128] sm:$0xff]   ;;  %v3393_v11 = vld [vmem:[%s3202_s14 + $0x80] sm:$0xff]  ;;  %v1261_v25 = vpack.c.bf16 %v3381_v7, %v3366_v2 }
  0x23   : > { %2786 = vmatpush3.bf16.msra.mxu1 %v3014_v14  ;;  %2763 = vmatprep.subr.bf16.mxu0 %v3015_v18  ;;  %v3385_v8 = vld [vmem:[%s3202_s14 + $0x72] sm:$0xff]  ;;  %v930_v14 = vpack.c.bf16 %v3393_v11, %v3289_v40  ;;  %v3041_v15 = vld [vmem:[%s3711_s1 + $0x120] sm:$0xff]   ;;  %v1095_v40 = vpack.c.bf16 %v3293_v41, %v3268_v34  ;;  %v3056_v34 = vld [vmem:[%s3711_s1 + $0x1e8] sm:$0xff]  }
  0x24   : > { %2787 = vmatprep.subr.bf16.mxu1 %v3016_v19  ;;  %v3401_v13 = vpack.c.bf16 %v3385_v8, %v3381_v7  ;;  %v3042_v17 = vld [vmem:[%s3711_s1 + $0x160] sm:$0xff]   ;;  %v3046_v22 = vld [vmem:[%s3711_s1 + $0x150] sm:$0xff]  }
  0x25   : > { %v3053_v37 = vld [vmem:[%s3711_s1 + $0x1b0] sm:$0xff]   ;;  %v3468_v32 = vld [vmem:[%s3202_s14 + $0x81] sm:$0xff] }
  0x26   : > { %2764 = vmatpush3.bf16.msra.mxu0 %v3015_v18  ;;  %v1093_v18 = vpack.c.bf16 %v3237_v24, %v3217_v16  ;;  %v3045_v16 = vld [vmem:[%s3711_s1 + $0x110] sm:$0xff]   ;;  %v3048_v24 = vld [vmem:[%s3711_s1 + $0x148] sm:$0xff]   ;;  %v1096_v41 = vpack.c.bf16 %v3468_v32, %v3296_v42  ;;  %v3059_v42 = vld [vmem:[%s3711_s1 + $0x198] sm:$0xff]  }
  0x27   : > { %2788 = vmatpush3.bf16.msra.mxu1 %v3016_v19  ;;  %2765 = vmatprep.subr.bf16.mxu0 %v3017_v20  ;;  %v1259_v19 = vpack.c.bf16 %v754_v60, %v3309_v46  ;;  %v3474_v45 = vld [vmem:[%s3202_s14 + $0x82] sm:$0xff]  ;;  %v3077_v2 = vld [vmem:[%s3430_s16 + $0x10] sm:$0xff]  }
  0x28   : > { %2789 = vmatprep.subr.bf16.mxu1 %v3018_v21  ;;  %v1262_v46 = vpack.c.bf16 %v3474_v45, %v3385_v8  ;;  %v3069_v60 = vld [vmem:[%s3711_s1 + $0x228] sm:$0xff]  }
  0x2a   : > { %2766 = vmatpush3.bf16.msra.mxu0 %v3017_v20  ;;  %v3043_v20 = vld [vmem:[%s3711_s1 + $0x118] sm:$0xff]  }
  0x2b   : > { %2790 = vmatpush3.bf16.msra.mxu1 %v3018_v21  ;;  %2799 = vmatprep.subr.bf16.mxu0 %v3019_v26  ;;  %v3044_v21 = vld [vmem:[%s3711_s1 + $0x158] sm:$0xff]  }
  0x2c   : > { %2823 = vmatprep.subr.bf16.mxu1 %v3020_v27 }
  0x2d   : > { %2768 = vmatmul.mubr.bf16.vlgmr.msra.gmra.mxu0 %v3249_v28 }
  0x2e   : > { %2792 = vmatmul.mubr.bf16.vlgmr.msra.gmra.mxu1 %v3265_v33  ;;  %2800 = vmatpush3.bf16.msra.mxu0 %v3019_v26  ;;  %v3049_v26 = vld [vmem:[%s3711_s1 + $0x100] sm:$0xff]  }
  0x2f   : > { %2824 = vmatpush3.bf16.msra.mxu1 %v3020_v27  ;;  %2801 = vmatprep.subr.bf16.mxu0 %v3021_v29  ;;  %v3050_v27 = vld [vmem:[%s3711_s1 + $0x140] sm:$0xff]  }
  0x30   : > { %2825 = vmatprep.subr.bf16.mxu1 %v3022_v35  ;;  %2771 = vmatprep.mubr.bf16.mxu0 %v3275_v36 }
  0x31   : > { %2795 = vmatprep.mubr.bf16.mxu1 %v3286_v39 }
  0x32   : > { %2802 = vmatpush3.bf16.msra.mxu0 %v3021_v29  ;;  %v3051_v29 = vld [vmem:[%s3711_s1 + $0x1b8] sm:$0xff]  }
  0x33   : > { %2826 = vmatpush3.bf16.msra.mxu1 %v3022_v35  ;;  %2803 = vmatprep.subr.bf16.mxu0 %v3023_v38  ;;  %v1260_v35 = vpack.c.bf16 %v3360_v0, %v3351_v61  ;;  %v2526_v61 = vld [vmem:[%s3202_s14 + $0x91] sm:$0xff] }
  0x34   : > { %2827 = vmatprep.subr.bf16.mxu1 %v3024_v43  ;;  %v3072_v0 = vld [vmem:[%s3711_s1 + $0x210] sm:$0xff]  }
  0x35   : > { %2772 = vmatmul.mubr.bf16.gmra.mxu0 %v3305_v44 }
  0x36   : > { %2804 = vmatpush3.bf16.msra.mxu0 %v3023_v38  ;;  %2796 = vmatmul.mubr.bf16.gmra.mxu1 %v3313_v47  ;;  %v3054_v38 = vld [vmem:[%s3711_s1 + $0x1f0] sm:$0xff]  }
  0x37   : > { %2828 = vmatpush3.bf16.msra.mxu1 %v3024_v43  ;;  %2805 = vmatprep.subr.bf16.mxu0 %v3025_v48  ;;  %v3055_v43 = vld [vmem:[%s3711_s1 + $0x1a8] sm:$0xff]  }
  0x38   : > { %2829 = vmatprep.subr.bf16.mxu1 %v3026_v49  ;;  %2815 = vmatprep.mubr.bf16.mxu0 %v760_v50  ;;  %v3060_v50 = vld [vmem:[%s3711_s1 + $0x1d8] sm:$0xff]  }
  0x39   : > { %2839 = vmatprep.mubr.bf16.mxu1 %v927_v51  ;;  %v3061_v51 = vld [vmem:[%s3711_s1 + $0x190] sm:$0xff]  }
  0x3a   : > { %2806 = vmatpush3.bf16.msra.mxu0 %v3025_v48  ;;  %v3057_v48 = vld [vmem:[%s3711_s1 + $0x1a0] sm:$0xff]  }
  0x3b   : > { %2830 = vmatpush3.bf16.msra.mxu1 %v3026_v49  ;;  %2807 = vmatprep.subr.bf16.mxu0 %v3027_v52  ;;  %v3058_v49 = vld [vmem:[%s3711_s1 + $0x1e0] sm:$0xff]  }
  0x3c   : > { %2831 = vmatprep.subr.bf16.mxu1 %v3028_v53 }
  0x3e   : > { %2808 = vmatpush3.bf16.msra.mxu0 %v3027_v52  ;;  %v3062_v52 = vld [vmem:[%s3711_s1 + $0x1d0] sm:$0xff]  }
  0x3f   : > { %2832 = vmatpush3.bf16.msra.mxu1 %v3028_v53  ;;  %2809 = vmatprep.subr.bf16.mxu0 %v3029_v54  ;;  %v3065_v53 = vld [vmem:[%s3711_s1 + $0x180] sm:$0xff]  }
  0x40   : > { %2833 = vmatprep.subr.bf16.mxu1 %v3030_v55 }
  0x42   : > { %2810 = vmatpush3.bf16.msra.mxu0 %v3029_v54  ;;  %v3066_v54 = vld [vmem:[%s3711_s1 + $0x1c0] sm:$0xff]  }
  0x43   : > { %2834 = vmatpush3.bf16.msra.mxu1 %v3030_v55  ;;  %2811 = vmatprep.subr.bf16.mxu0 %v3031_v56  ;;  %v3067_v55 = vld [vmem:[%s3711_s1 + $0x238] sm:$0xff]  }
  0x44   : > { %2835 = vmatprep.subr.bf16.mxu1 %v3032_v57 }
  0x46   : > { %2812 = vmatpush3.bf16.msra.mxu0 %v3031_v56  ;;  %v1924_v56 = vld [vmem:[%s3715_s5] sm:$0x3] }
  0x47   : > { %2836 = vmatpush3.bf16.msra.mxu1 %v3032_v57  ;;  %2813 = vmatprep.subr.bf16.mxu0 %v3033_v58  ;;  %v3068_v57 = vld [vmem:[%s3711_s1 + $0x230] sm:$0xff]  }
  0x48   : > { %2837 = vmatprep.subr.bf16.mxu1 %v3034_v59 }
  0x4a   : > { %2814 = vmatpush3.bf16.msra.mxu0 %v3033_v58  ;;  %v1960_v58 = vsel %vm1958_vm0, %v1924_v56, 0 }
  0x4b   : > { %2838 = vmatpush3.bf16.msra.mxu1 %v3034_v59  ;;  %2847 = vmatprep.subr.bf16.mxu0 %v3035_v62  ;;  %v2494_v59 = vld [vmem:[%s3202_s14 + $0x90] sm:$0xff] }
  0x4c   : > { %2871 = vmatprep.subr.bf16.mxu1 %v3036_v63 }
  0x4d   : > { %2816 = vmatmul.mubr.bf16.vlgmr.msra.gmra.mxu0 %v3363_v1 }
  0x4e   : > { %2848 = vmatpush3.bf16.msra.mxu0 %v3035_v62  ;;  %2840 = vmatmul.mubr.bf16.vlgmr.msra.gmra.mxu1 %v928_v3  ;;  %v1595_v62 = vpack.c.bf16 %v2526_v61, %v3468_v32  ;;  %v3073_v3 = vld [vmem:[%s3711_s1 + $0x208] sm:$0xff]  }
  0x4f   : > { %2872 = vmatpush3.bf16.msra.mxu1 %v3036_v63  ;;  %2849 = vmatprep.subr.bf16.mxu0 %v3037_v4  ;;  %v3076_v63 = vld [vmem:[%s3430_s16 + $0x8] sm:$0xff]  }
  0x50   : > { %2873 = vmatprep.subr.bf16.mxu1 %v3038_v5  ;;  %2819 = vmatprep.mubr.bf16.mxu0 %v3378_v6 }
  0x51   : > { %2843 = vmatprep.mubr.bf16.mxu1 %v929_v9 }
  0x52   : > { %2850 = vmatpush3.bf16.msra.mxu0 %v3037_v4  ;;  %v3075_v4 = vld [vmem:[%s3711_s1 + $0x200] sm:$0xff]  }
  0x53   : > { %2874 = vmatpush3.bf16.msra.mxu1 %v3038_v5  ;;  %2851 = vmatprep.subr.bf16.mxu0 %v3039_v10  ;;  %v2558_v5 = vld [vmem:[%s3202_s14 + $0x92] sm:$0xff] }
  0x54   : > { %2875 = vmatprep.subr.bf16.mxu1 %v3040_v12  ;;  %v1761_v7 = vpack.c.bf16 %v2558_v5, %v3474_v45 }
  0x55   : > { %2820 = vmatmul.mubr.bf16.gmra.mxu0 %v3401_v13 }
  0x56   : > { %2852 = vmatpush3.bf16.msra.mxu0 %v3039_v10  ;;  %2844 = vmatmul.mubr.bf16.gmra.mxu1 %v930_v14 }
  0x57   : > { %2876 = vmatpush3.bf16.msra.mxu1 %v3040_v12  ;;  %2853 = vmatprep.subr.bf16.mxu0 %v3041_v15 }
  0x58   : > { %2877 = vmatprep.subr.bf16.mxu1 %v3042_v17  ;;  %2863 = vmatprep.mubr.bf16.mxu0 %v1093_v18 }
  0x59   : > { %2887 = vmatprep.mubr.bf16.mxu1 %v1259_v19 }
  0x5a   : > { %2854 = vmatpush3.bf16.msra.mxu0 %v3041_v15 }
  0x5b   : > { %2878 = vmatpush3.bf16.msra.mxu1 %v3042_v17  ;;  %2855 = vmatprep.subr.bf16.mxu0 %v3043_v20 }
  0x5c   : > { %2879 = vmatprep.subr.bf16.mxu1 %v3044_v21 }
  0x5e   : > { %2856 = vmatpush3.bf16.msra.mxu0 %v3043_v20 }
  0x5f   : > { %2880 = vmatpush3.bf16.msra.mxu1 %v3044_v21  ;;  %2857 = vmatprep.subr.bf16.mxu0 %v3045_v16 }
  0x60   : > { %2881 = vmatprep.subr.bf16.mxu1 %v3046_v22 }
  0x62   : > { %2858 = vmatpush3.bf16.msra.mxu0 %v3045_v16 }
  0x63   : > { %2882 = vmatpush3.bf16.msra.mxu1 %v3046_v22  ;;  %2859 = vmatprep.subr.bf16.mxu0 %v3047_v23 }
  0x64   : > { %2883 = vmatprep.subr.bf16.mxu1 %v3048_v24 }
  0x66   : > { %2860 = vmatpush3.bf16.msra.mxu0 %v3047_v23 }
  0x67   : > { %2884 = vmatpush3.bf16.msra.mxu1 %v3048_v24  ;;  %2861 = vmatprep.subr.bf16.mxu0 %v3049_v26 }
  0x68   : > { %2885 = vmatprep.subr.bf16.mxu1 %v3050_v27 }
  0x6a   : > { %2862 = vmatpush3.bf16.msra.mxu0 %v3049_v26 }
  0x6b   : > { %2886 = vmatpush3.bf16.msra.mxu1 %v3050_v27  ;;  %2895 = vmatprep.subr.bf16.mxu0 %v3051_v29 }
  0x6c   : > { %2919 = vmatprep.subr.bf16.mxu1 %v3052_v30 }
  0x6d   : > { %2864 = vmatmul.mubr.bf16.vlgmr.msra.gmra.mxu0 %v1094_v31 }
  0x6e   : > { %2896 = vmatpush3.bf16.msra.mxu0 %v3051_v29  ;;  %2888 = vmatmul.mubr.bf16.vlgmr.msra.gmra.mxu1 %v1260_v35 }
  0x6f   : > { %2920 = vmatpush3.bf16.msra.mxu1 %v3052_v30  ;;  %2897 = vmatprep.subr.bf16.mxu0 %v3053_v37 }
  0x70   : > { %2921 = vmatprep.subr.bf16.mxu1 %v3054_v38  ;;  %2867 = vmatprep.mubr.bf16.mxu0 %v1095_v40 }
  0x71   : > { %2891 = vmatprep.mubr.bf16.mxu1 %v1261_v25 }
  0x72   : > { %2898 = vmatpush3.bf16.msra.mxu0 %v3053_v37 }
  0x73   : > { %2922 = vmatpush3.bf16.msra.mxu1 %v3054_v38  ;;  %2899 = vmatprep.subr.bf16.mxu0 %v3055_v43 }
  0x74   : > { %2923 = vmatprep.subr.bf16.mxu1 %v3056_v34 }
  0x75   : > { %2868 = vmatmul.mubr.bf16.gmra.mxu0 %v1096_v41 }
  0x76   : > { %2900 = vmatpush3.bf16.msra.mxu0 %v3055_v43  ;;  %2892 = vmatmul.mubr.bf16.gmra.mxu1 %v1262_v46 }
  0x77   : > { %2924 = vmatpush3.bf16.msra.mxu1 %v3056_v34  ;;  %2901 = vmatprep.subr.bf16.mxu0 %v3057_v48 }
  0x78   : > { %2925 = vmatprep.subr.bf16.mxu1 %v3058_v49  ;;  %2911 = vmatprep.mubr.bf16.mxu0 %v3249_v28  ;;  %v3063_v28 = vld [vmem:[%s3711_s1 + $0x188] sm:$0xff]  }
  0x79   : > { %2935 = vmatprep.mubr.bf16.mxu1 %v3265_v33  ;;  %v3064_v33 = vld [vmem:[%s3711_s1 + $0x1c8] sm:$0xff]  }
  0x7a   : > { %2902 = vmatpush3.bf16.msra.mxu0 %v3057_v48 }
  0x7b   : > { %2926 = vmatpush3.bf16.msra.mxu1 %v3058_v49  ;;  %2903 = vmatprep.subr.bf16.mxu0 %v3059_v42 }
  0x7c   : > { %2927 = vmatprep.subr.bf16.mxu1 %v3060_v50 }
  0x7e   : > { %2904 = vmatpush3.bf16.msra.mxu0 %v3059_v42 }
  0x7f   : > { %2928 = vmatpush3.bf16.msra.mxu1 %v3060_v50  ;;  %2905 = vmatprep.subr.bf16.mxu0 %v3061_v51 }
  0x80   : > { %2929 = vmatprep.subr.bf16.mxu1 %v3062_v52 }
  0x82   : > { %2906 = vmatpush3.bf16.msra.mxu0 %v3061_v51 }
  0x83   : > { %2930 = vmatpush3.bf16.msra.mxu1 %v3062_v52  ;;  %2907 = vmatprep.subr.bf16.mxu0 %v3063_v28 }
  0x84   : > { %2931 = vmatprep.subr.bf16.mxu1 %v3064_v33 }
  0x86   : > { %2908 = vmatpush3.bf16.msra.mxu0 %v3063_v28 }
  0x87   : > { %2932 = vmatpush3.bf16.msra.mxu1 %v3064_v33  ;;  %2909 = vmatprep.subr.bf16.mxu0 %v3065_v53 }
  0x88   : > { %2933 = vmatprep.subr.bf16.mxu1 %v3066_v54 }
  0x8a   : > { %2910 = vmatpush3.bf16.msra.mxu0 %v3065_v53 }
  0x8b   : > { %2934 = vmatpush3.bf16.msra.mxu1 %v3066_v54  ;;  %2943 = vmatprep.subr.bf16.mxu0 %v3067_v55 }
  0x8c   : > { %2977 = vmatprep.subr.msk.bf16.mxu1 %vm1958_vm0, %v1924_v56 }
  0x8d   : > { %2912 = vmatmul.mubr.bf16.vlgmr.msra.gmra.mxu0 %v3275_v36  ;;  %v1429_v36 = vpack.c.bf16 %v2494_v59, %v3393_v11 }
  0x8e   : > { %2944 = vmatpush3.bf16.msra.mxu0 %v3067_v55  ;;  %2936 = vmatmul.mubr.bf16.vlgmr.msra.gmra.mxu1 %v3286_v39  ;;  %v3070_v39 = vld [vmem:[%s3711_s1 + $0x220] sm:$0xff]  }
  0x8f   : > { %2945 = vmatprep.subr.bf16.mxu0 %v3068_v57  ;;  %2915 = vmatprep.mubr.bf16.mxu0 %v3305_v44  ;;  %v3074_v44 = vld [vmem:[%s3430_s16] sm:$0xff]  }
  0x90   : > { %2939 = vmatprep.mubr.bf16.mxu1 %v3313_v47  ;;  %2968 = vmatpush3.bf16.msra.mxu1 %v1960_v58  ;;  %v3071_v47 = vld [vmem:[%s3711_s1 + $0x218] sm:$0xff]  }
  0x92   : > { %2946 = vmatpush3.bf16.msra.mxu0 %v3068_v57 }
  0x93   : > { %2947 = vmatprep.subr.bf16.mxu0 %v3069_v60 }
  0x95   : > { %2916 = vmatmul.mubr.bf16.gmra.mxu0 %v1429_v36 }
  0x96   : > { %2948 = vmatpush3.bf16.msra.mxu0 %v3069_v60  ;;  %2940 = vmatmul.mubr.bf16.gmra.mxu1 %v1595_v62 }
  0x97   : > { %2949 = vmatprep.subr.bf16.mxu0 %v3070_v39  ;;  %2969 = vmatprep.mubr.msk.bf16.mxu1 %vm1945_vm1, %v3074_v44 }
  0x98   : > { %2959 = vmatprep.mubr.bf16.mxu0 %v3363_v1  ;;  %v3078_v1 = vld [vmem:[%s3430_s16 + $0x18] sm:$0xff]  }
  0x9a   : > { %2950 = vmatpush3.bf16.msra.mxu0 %v3070_v39 }
  0x9b   : > { %2951 = vmatprep.subr.bf16.mxu0 %v3071_v47 }
  0x9e   : > { %2952 = vmatpush3.bf16.msra.mxu0 %v3071_v47  ;;  %2970 = vmatmul.mubr.msk.bf16.vlgmr.msra.gmra.mxu1 %vm1945_vm1, %v3076_v63 }
  0x9f   : > { %2953 = vmatprep.subr.bf16.mxu0 %v3072_v0  ;;  %2973 = vmatprep.mubr.msk.bf16.mxu1 %vm1945_vm1, %v3077_v2 }
  0xa2   : > { %2954 = vmatpush3.bf16.msra.mxu0 %v3072_v0 }
  0xa3   : > { %2955 = vmatprep.subr.bf16.mxu0 %v3073_v3 }
  0xa6   : > { %2956 = vmatpush3.bf16.msra.mxu0 %v3073_v3  ;;  %2974 = vmatmul.mubr.msk.bf16.gmra.mxu1 %vm1945_vm1, %v3078_v1 }
  0xa7   : > { %2957 = vmatprep.subr.bf16.mxu0 %v3075_v4 }
  0xaa   : > { %2958 = vmatpush3.bf16.msra.mxu0 %v3075_v4 }
  0xad   : > { %2960 = vmatmul.mubr.bf16.vlgmr.msra.gmra.mxu0 %v3378_v6 }
  0xae   : > { %2963 = vmatprep.mubr.bf16.mxu0 %v3401_v13 }
  0xb5   : > { %2964 = vmatmul.mubr.bf16.gmra.mxu0 %v1761_v7 }
  0xed   : > { %v2769_v9 = vpop.f32.mrf.mxu0 }
  0xee   : > { %v2793_v8 = vpop.f32.mrf.mxu1 }
  0xef   : > { %v547_v11 = vpop.f32.mrf.mxu0  ;;  %v738_v0 = vadd.f32 %v2793_v8, %v2769_v9 }
  0xf0   : > { %v697_v10 = vpop.f32.mrf.mxu1 }
  0xf1   : > { %v2770_v14 = vpop.f32.mrf.mxu0  ;;  %v736_v1 = vadd.f32 %v697_v10, %v547_v11 }
  0xf2   : > { %v2794_v12 = vpop.f32.mrf.mxu1 }
  0xf3   : > { %v550_v17 = vpop.f32.mrf.mxu0  ;;  %v739_v7 = vadd.f32 %v2794_v12, %v2770_v14 }
  0xf4   : > { %v700_v15 = vpop.f32.mrf.mxu1 }
  0xf5   : > { %v2773_v19 = vpop.f32.mrf.mxu0 }
  0xf6   : > { %v3563_v18 = vpop.f32.mrf.mxu1 }
  0xf7   : > { %v3567_v6 = vpop.f32.mrf.mxu0 }
  0xf8   : > { %v3565_v20 = vpop.f32.mrf.mxu1 }
  0xf9   : > { %v3571_v21 = vpop.f32.mrf.mxu0  ;;  %v740_v9 = vadd.f32 %v3565_v20, %v3567_v6 }
  0xfa   : > { %v3569_v13 = vpop.f32.mrf.mxu1 }
  0xfb   : > { %v3575_v22 = vpop.f32.mrf.mxu0  ;;  %v743_v10 = vadd.f32 %v3569_v13, %v3571_v21 }
  0xfc   : > { %v3573_v16 = vpop.f32.mrf.mxu1 }
 0x10d   : > { %v2817_v24 = vpop.f32.mrf.mxu0 }
 0x10e   : > { %v2841_v23 = vpop.f32.mrf.mxu1  ;;  %v904_v4 = vadd.f32 %v2817_v24, %v738_v0 }
 0x10f   : > { %v863_v27 = vpop.f32.mrf.mxu0 }
 0x110   : > { %v1030_v26 = vpop.f32.mrf.mxu1 }
 0x111   : > { %v2818_v30 = vpop.f32.mrf.mxu0 }
 0x112   : > { %v2842_v29 = vpop.f32.mrf.mxu1 }
 0x113   : > { %v866_v35 = vpop.f32.mrf.mxu0 }
 0x114   : > { %v1033_v31 = vpop.f32.mrf.mxu1 }
 0x115   : > { %v2821_v38 = vpop.f32.mrf.mxu0 }
 0x116   : > { %v3577_v37 = vpop.f32.mrf.mxu1 }
 0x117   : > { %v879_v25 = vpop.f32.mrf.mxu0 }
 0x118   : > { %v3579_v40 = vpop.f32.mrf.mxu1 }
 0x119   : > { %v2822_v43 = vpop.f32.mrf.mxu0 }
 0x11a   : > { %v3581_v32 = vpop.f32.mrf.mxu1 }
 0x11b   : > { %v3585_v34 = vpop.f32.mrf.mxu0 }
 0x11c   : > { %v3583_v45 = vpop.f32.mrf.mxu1 }
 0x12d   : > { %v2865_v46 = vpop.f32.mrf.mxu0 }
 0x12e   : > { %v2889_v41 = vpop.f32.mrf.mxu1 }
 0x12f   : > { %v1196_v49 = vpop.f32.mrf.mxu0 }
 0x130   : > { %v1362_v48 = vpop.f32.mrf.mxu1 }
 0x131   : > { %v2866_v50 = vpop.f32.mrf.mxu0 }
 0x132   : > { %v2890_v42 = vpop.f32.mrf.mxu1 }
 0x133   : > { %v1199_v52 = vpop.f32.mrf.mxu0 }
 0x134   : > { %v3587_v51 = vpop.f32.mrf.mxu1 }
 0x135   : > { %v2869_v33 = vpop.f32.mrf.mxu0 }
 0x136   : > { %v3589_v28 = vpop.f32.mrf.mxu1 }
 0x137   : > { %3719 = vst [vmem:[#allocation3_spill] sm:$0xff] %v3589_v28  ;;  %v1212_v54 = vpop.f32.mrf.mxu0 }
 0x138   : > { %v3591_v53 = vpop.f32.mrf.mxu1 }
 0x139   : > { %3720 = vst [vmem:[#allocation4_spill] sm:$0xff] %v3591_v53  ;;  %v2870_v56 = vpop.f32.mrf.mxu0  ;;  %v1071_v53 = vadd.f32 %v2841_v23, %v904_v4  ;;  %v909_v23 = vadd.f32 %v2822_v43, %v743_v10  ;;  %v3627_v43 = vld [vmem:[%s3716_s6] ss:$0 sm:$0xff] }
 0x13a   : > { %v3593_v55 = vpop.f32.mrf.mxu1 }
 0x13b   : > { %3721 = vst [vmem:[#allocation5_spill] sm:$0xff] %v3593_v55  ;;  %v3597_v58 = vpop.f32.mrf.mxu0 }
 0x13c   : > { %v3595_v57 = vpop.f32.mrf.mxu1  ;;  %3723 = vst [vmem:[#allocation7_spill] sm:$0xff] %v3597_v58 }
 0x13d   : > { %3722 = vst [vmem:[#allocation6_spill] sm:$0xff] %v3595_v57  ;;  %v902_v57 = vadd.f32 %v863_v27, %v736_v1 }
 0x13f   : > { %v1069_v28 = vadd.f32 %v1030_v26, %v902_v57 }
 0x140   : > { %v3731_v57 = vld [vmem:[#allocation4_spill] sm:$0xff] }
 0x141   : > { %v1235_v24 = vadd.f32 %v1196_v49, %v1069_v28  ;;  %v3729_v28 = vld [vmem:[#allocation3_spill] sm:$0xff] }
 0x143   : > { %v1401_v6 = vadd.f32 %v1362_v48, %v1235_v24 }
 0x14d   : > { %v2913_v60 = vpop.f32.mrf.mxu0 }
 0x14e   : > { %v2937_v59 = vpop.f32.mrf.mxu1 }
 0x14f   : > { %v1529_v62 = vpop.f32.mrf.mxu0 }
 0x150   : > { %v3599_v61 = vpop.f32.mrf.mxu1 }
 0x151   : > { %3724 = vst [vmem:[#allocation8_spill] sm:$0xff] %v3599_v61  ;;  %v2914_v47 = vpop.f32.mrf.mxu0 }
 0x152   : > { %v3601_v36 = vpop.f32.mrf.mxu1 }
 0x153   : > { %3725 = vst [vmem:[#allocation9_spill] sm:$0xff] %v3601_v36  ;;  %v1532_v3 = vpop.f32.mrf.mxu0  ;;  %v737_v36 = vadd.f32 %v700_v15, %v550_v17  ;;  %v906_v17 = vadd.f32 %v879_v25, %v740_v9  ;;  %v1568_v25 = vadd.f32 %v1529_v62, %v1401_v6  ;;  %v3650_v62 = vld [vmem:[%s3713_s3] ss:$0 sm:$0xff] }
 0x154   : > { %v3603_v39 = vpop.f32.mrf.mxu1 }
 0x155   : > { %3726 = vst [vmem:[#allocation10_spill] sm:$0xff] %v3603_v39  ;;  %v2917_v58 = vpop.f32.mrf.mxu0  ;;  %v905_v39 = vadd.f32 %v2818_v30, %v739_v7  ;;  %v903_v61 = vadd.f32 %v866_v35, %v737_v36  ;;  %v1073_v13 = vadd.f32 %v3579_v40, %v906_v17 }
 0x156   : > { %v3605_v44 = vpop.f32.mrf.mxu1 }
 0x157   : > { %3727 = vst [vmem:[#allocation11_spill] sm:$0xff] %v3605_v44  ;;  %v742_v44 = vadd.f32 %v3563_v18, %v2773_v19  ;;  %v1545_v11 = vpop.f32.mrf.mxu0  ;;  %v1072_v12 = vadd.f32 %v2842_v29, %v905_v39  ;;  %v1070_v15 = vadd.f32 %v1033_v31, %v903_v61  ;;  %v741_v18 = vadd.f32 %v3573_v16, %v3575_v22  ;;  %v3733_v61 = vld [vmem:[#allocation5_spill] sm:$0xff] }
 0x158   : > { %v3607_v63 = vpop.f32.mrf.mxu1  ;;  %v1076_v29 = vadd.f32 %v3581_v32, %v909_v23 }
 0x159   : > { %3728 = vst [vmem:[#allocation12_spill] sm:$0xff] %v3607_v63  ;;  %v1237_v63 = vadd.f32 %v2865_v46, %v1071_v53  ;;  %v908_v14 = vadd.f32 %v2821_v38, %v742_v44  ;;  %v1238_v30 = vadd.f32 %v2866_v50, %v1072_v12  ;;  %v1236_v19 = vadd.f32 %v1199_v52, %v1070_v15  ;;  %v2918_v26 = vpop.f32.mrf.mxu0  ;;  %v3635_v52 = vld [vmem:[%s3712_s2] ss:$0 sm:$0xff]  ;;  %v3730_v53 = vld [vmem:[#allocation8_spill] sm:$0xff] }
 0x15a   : > { %v3609_v2 = vpop.f32.mrf.mxu1  ;;  %v907_v21 = vadd.f32 %v3585_v34, %v741_v18  ;;  %v3734_v44 = vld [vmem:[#allocation9_spill] sm:$0xff]  ;;  %v3736_v18 = vld [vmem:[#allocation6_spill] sm:$0xff] }
 0x15b   : > { %v1403_v27 = vadd.f32 %v2889_v41, %v1237_v63  ;;  %v1075_v20 = vadd.f32 %v3577_v37, %v908_v14  ;;  %v1404_v31 = vadd.f32 %v2890_v42, %v1238_v30  ;;  %v1402_v22 = vadd.f32 %v3587_v51, %v1236_v19  ;;  %v1548_v48 = vpop.f32.mrf.mxu0 }
 0x15c   : > { %v3611_v5 = vpop.f32.mrf.mxu1  ;;  %v1239_v37 = vadd.f32 %v1212_v54, %v1073_v13  ;;  %v1242_v41 = vadd.f32 %v2870_v56, %v1076_v29  ;;  %v1074_v34 = vadd.f32 %v3583_v45, %v907_v21  ;;  %v1734_v51 = vadd.f32 %v3730_v53, %v1568_v25  ;;  %v3642_v54 = vld [vmem:[%s3717_s7] ss:$0 sm:$0xff]  ;;  %v3735_v1 = vld [vmem:[#allocation10_spill] sm:$0xff] }
 0x15d   : > { %v1570_v46 = vadd.f32 %v2913_v60, %v1403_v27  ;;  %v1241_v38 = vadd.f32 %v2869_v33, %v1075_v20  ;;  %v1571_v40 = vadd.f32 %v2914_v47, %v1404_v31  ;;  %v1569_v50 = vadd.f32 %v1532_v3, %v1402_v22 }
 0x15e   : > { %v2971_v55 = vpop.f32.mrf.mxu1  ;;  %v1408_v36 = vadd.f32 %v3733_v61, %v1242_v41  ;;  %v3737_v6 = vld [vmem:[#allocation11_spill] sm:$0xff] }
 0x15f   : > { %v1736_v49 = vadd.f32 %v2937_v59, %v1570_v46  ;;  %v2036_v32 = vmul.f32 %v2971_v55, %v3627_v43  ;;  %v1407_v33 = vadd.f32 %v3729_v28, %v1241_v38  ;;  %v1405_v59 = vadd.f32 %v3731_v57, %v1239_v37  ;;  %v3732_v55 = vld [vmem:[#allocation7_spill] sm:$0xff] }
 0x160   : > { %v1996_v8 = vpop.f32.mrf.mxu1  ;;  %v1240_v60 = vadd.f32 %v3732_v55, %v1074_v34  ;;  %v1737_v47 = vadd.f32 %v3734_v44, %v1571_v40  ;;  %v1735_v4 = vadd.f32 %v3735_v1, %v1569_v50  ;;  %v3738_v13 = vld [vmem:[#allocation12_spill] sm:$0xff] }
 0x161   : > { %v1574_v63 = vadd.f32 %v2917_v58, %v1407_v33  ;;  %v1572_v7 = vadd.f32 %v1545_v11, %v1405_v59  ;;  %v2051_v9 = vadd.f32 %v3642_v54, %v2036_v32  ;;  %v2034_v10 = vmul.f32 %v3627_v43, %v1996_v8 }
 0x162   : > { %v2972_v35 = vpop.f32.mrf.mxu1  ;;  %v1575_v58 = vadd.f32 %v2918_v26, %v1408_v36  ;;  %v1406_v19 = vadd.f32 %v3736_v18, %v1240_v60 }
 0x163   : > { %v2037_v24 = vmul.f32 %v2972_v35, %v3627_v43  ;;  %v1740_v46 = vadd.f32 %v3737_v6, %v1574_v63  ;;  %v1738_v21 = vadd.f32 %v3738_v13, %v1572_v7  ;;  %v2049_v26 = vadd.f32 %v3642_v54, %v2034_v10 }
 0x164   : > { %v1999_v16 = vpop.f32.mrf.mxu1  ;;  %v1573_v37 = vadd.f32 %v1548_v48, %v1406_v19  ;;  %v1741_v41 = vadd.f32 %v3609_v2, %v1575_v58 }
 0x165   : > { %v2035_v27 = vmul.f32 %v3627_v43, %v1999_v16  ;;  %v2052_v38 = vadd.f32 %v3642_v54, %v2037_v24 }
 0x166   : > { %v2975_v45 = vpop.f32.mrf.mxu1  ;;  %v1739_v60 = vadd.f32 %v3611_v5, %v1573_v37 }
 0x167   : > { %v2040_v29 = vmul.f32 %v2975_v45, %v3627_v43 }
 0x168   : > { %v2012_v23 = vpop.f32.mrf.mxu1 }
 0x169   : > { %v2055_v53 = vadd.f32 %v3642_v54, %v2040_v29  ;;  %v2038_v61 = vmul.f32 %v3627_v43, %v2012_v23 }
 0x16a   : > { %v2976_v22 = vpop.f32.mrf.mxu1 }
 0x16c   : > { %v2015_v59 = vpop.f32.mrf.mxu1 }
 0x16d   : > { %v2961_v42 = vpop.f32.mrf.mxu0 }
 0x16e   : > { %v1902_v56 = vadd.f32 %v2961_v42, %v1736_v49  ;;  %v2050_v49 = vadd.f32 %v3642_v54, %v2035_v27 }
 0x16f   : > { %v1861_v39 = vpop.f32.mrf.mxu0 }
 0x170   : > { %v2074_v0 = vmul.f32 %v3635_v52, %v1902_v56  ;;  %v1900_v3 = vadd.f32 %v1861_v39, %v1734_v51  ;;  %v2041_v56 = vmul.f32 %v2976_v22, %v3627_v43 }
 0x171   : > { %v2962_v12 = vpop.f32.mrf.mxu0 }
 0x172   : > { %v2089_v14 = vadd.f32 %v3650_v62, %v2074_v0  ;;  %v2072_v15 = vmul.f32 %v3635_v52, %v1900_v3  ;;  %v1903_v17 = vadd.f32 %v2962_v12, %v1737_v47  ;;  %v2039_v3 = vmul.f32 %v3627_v43, %v2015_v59 }
 0x173   : > { %v1864_v30 = vpop.f32.mrf.mxu0  ;;  %v2053_v12 = vadd.f32 %v3642_v54, %v2038_v61 }
 0x174   : > { %v2087_v11 = vadd.f32 %v3650_v62, %v2072_v15  ;;  %v2075_v20 = vmul.f32 %v3635_v52, %v1903_v17  ;;  %v1901_v8 = vadd.f32 %v1864_v30, %v1735_v4  ;;  %v2097_v35 = vadd.f32 %v2089_v14, %v2051_v9 }
 0x175   : > { %v2965_v31 = vpop.f32.mrf.mxu0  ;;  %v2056_v9 = vadd.f32 %v3642_v54, %v2041_v56  ;;  %v2054_v17 = vadd.f32 %v3642_v54, %v2039_v3 }
 0x176   : > { %v2090_v25 = vadd.f32 %v3650_v62, %v2075_v20  ;;  %v2073_v16 = vmul.f32 %v3635_v52, %v1901_v8  ;;  %v1906_v40 = vadd.f32 %v2965_v31, %v1740_v46  ;;  %v2095_v50 = vadd.f32 %v2087_v11, %v2049_v26 }
 0x177   : > { %v1877_v34 = vpop.f32.mrf.mxu0  ;;  %v2105_v33 = vmax.f32 %v2097_v35, 0.0 }
 0x178   : > { %v2098_v32 = vadd.f32 %v2090_v25, %v2052_v38  ;;  %v2088_v42 = vadd.f32 %v3650_v62, %v2073_v16  ;;  %v1904_v28 = vadd.f32 %v1877_v34, %v1738_v21  ;;  %v2078_v51 = vmul.f32 %v3635_v52, %v1906_v40 }
 0x179   : > { %v2966_v48 = vpop.f32.mrf.mxu0  ;;  %v2103_v44 = vmax.f32 %v2095_v50, 0.0 }
 0x17a   : > { %v2106_v45 = vmax.f32 %v2098_v32, 0.0  ;;  %v2096_v2 = vadd.f32 %v2088_v42, %v2050_v49  ;;  %v2076_v57 = vmul.f32 %v3635_v52, %v1904_v28  ;;  %v1907_v55 = vadd.f32 %v2966_v48, %v1741_v41 }
 0x17b   : > { %v2093_v36 = vadd.f32 %v3650_v62, %v2078_v51  ;;  %v1880_v39 = vpop.f32.mrf.mxu0 }
 0x17c   : > { %v2623_v47 = vpack.c.bf16 %v2106_v45, %v2105_v33  ;;  %v2104_v63 = vmax.f32 %v2096_v2, 0.0  ;;  %v2079_v0 = vmul.f32 %v3635_v52, %v1907_v55  ;;  %v2091_v5 = vadd.f32 %v3650_v62, %v2076_v57 }
 0x17d   : > { %v1905_v1 = vadd.f32 %v1880_v39, %v1739_v60  ;;  %v2101_v7 = vadd.f32 %v2093_v36, %v2055_v53 }
 0x17e   : > { %2635 = vst [vmem:[%s3684_s25 + $0x8] sm:$0xff] %v2623_v47   ;;  %v2618_v4 = vpack.c.bf16 %v2104_v63, %v2103_v44  ;;  %v2094_v10 = vadd.f32 %v3650_v62, %v2079_v0  ;;  %v2099_v15 = vadd.f32 %v2091_v5, %v2053_v12 }
 0x17f   : > { %v2077_v14 = vmul.f32 %v3635_v52, %v1905_v1  ;;  %v2109_v23 = vmax.f32 %v2101_v7, 0.0 }
 0x180   : > { %2619 = vst [vmem:[%s3684_s25] sm:$0xff] %v2618_v4   ;;  %v2102_v24 = vadd.f32 %v2094_v10, %v2056_v9  ;;  %v2107_v18 = vmax.f32 %v2099_v15, 0.0 }
 0x181   : > { %v2092_v43 = vadd.f32 %v3650_v62, %v2077_v14 }
 0x182   : > { %v2110_v58 = vmax.f32 %v2102_v24, 0.0 }
 0x183   : > { %v2100_v27 = vadd.f32 %v2092_v43, %v2054_v17 }
 0x184   : > { %v2633_v30 = vpack.c.bf16 %v2110_v58, %v2109_v23 }
 0x185   : > { %v2108_v19 = vmax.f32 %v2100_v27, 0.0 }
 0x186   : > { %2637 = vst [vmem:[%s3684_s25 + $0x18] sm:$0xff] %v2633_v30  }
 0x187   : > { %v2628_v11 = vpack.c.bf16 %v2108_v19, %v2107_v18 }
 0x189   : > { %2636 = vst [vmem:[%s3684_s25 + $0x10] sm:$0xff] %v2628_v11  }
 0x18a PF: > { %s18_s29 = sadd.s32 1, %s3101_s29   ;;  %s3739_s27 = smov %s3097_s28 }
 0x18b   : > { %p15_p5 = scmp.ge.s32.totalorder %s18_s29, 4   ;;  %s3740_s28 = smov %s3742_s30 }
 0x18d   :  { %17 = sbr.rel (!%p15_p5) target bundleno = 2 (0x2), region = 113 }

</bundles_post_ra>
